<compile_context>
chip_gen: v5e
topology: v5e:2x2
jax: 0.10.0
libtpu: 0.0.40
codegen_flags: <defaults>
</compile_context>

<pallas_src>
import functools
import math

import jax
import jax.numpy as jnp
from jax.experimental import pallas as pl
from jax.experimental.pallas import tpu as pltpu

# ---------------- model config (small, consistent with the module) -------------
VOCAB = 128
HIDDEN = 32
N_LAYERS = 2
N_HEADS = 4
HEAD_DIM = HIDDEN // N_HEADS
INTER = 4 * HIDDEN
MAX_POS = 16
NUM_LABELS = 5
CLS_PAD = 128                       # lane-dense classifier / logits width
B, S = 2, 8
BS = B * S
NEG = -1e9
LN_EPS = 1e-12

_VMEM = pl.BlockSpec(memory_space=pltpu.MemorySpace.VMEM)

# ---------------- packed-slab row layouts (shared by init + kernel) ------------
# small slab: (SMALL_ROWS_PAD, 128) f32 -- biases / LN params / constants
SMALL_PER_LAYER = 8
ROW_EG = 0                          # emb LN gamma        (HIDDEN)
ROW_EB = 1                          # emb LN beta         (HIDDEN)
ROW_PT = 2                          # pos+type const      (BS rows x HIDDEN)
ROW_BCLS = ROW_PT + BS              # classifier bias     (CLS_PAD, pad cols = NEG)
ROW_L0 = ROW_BCLS + 1               # per-layer rows start
#   per layer (+0 bqkv(3H), +1 bo(H), +2 ln1_g, +3 ln1_b, +4 b1(INTER),
#              +5 b2(H), +6 ln2_g, +7 ln2_b)
SMALL_ROWS = ROW_L0 + N_LAYERS * SMALL_PER_LAYER
SMALL_ROWS_PAD = ((SMALL_ROWS + 7) // 8) * 8

# big slab: (BIG_ROWS, 128) f32 -- weight matrices, stacked along sublanes
W_WORD = 0                          # word embedding      (VOCAB x HIDDEN)
W_CLS = W_WORD + VOCAB              # classifier weight   (HIDDEN x CLS_PAD)
W_L0 = W_CLS + HIDDEN               # per-layer weights start
W_PER_LAYER = 3 * HIDDEN + INTER    # wqkv(H) + wo(H) + w1(H) + w2(INTER) rows
#   per layer (+0 wqkv Hx3H, +H wo HxH, +2H w1 HxINTER, +3H w2 INTERxH)
BIG_ROWS = W_L0 + N_LAYERS * W_PER_LAYER


# ---------------------------- fused forward kernel -----------------------------
def _layer_norm(x, g, b):
    # single-pass moments: both reductions can issue back-to-back on the XLUs
    mu = jnp.mean(x, axis=-1, keepdims=True)
    m2 = jnp.mean(x * x, axis=-1, keepdims=True)
    var = m2 - mu * mu
    return (x - mu) * jax.lax.rsqrt(var + LN_EPS) * g + b


def _gelu(x):
    # tanh-approx GELU.
    # TODO(synk): PyTorch nn.GELU defaults to exact erf-GELU (~1e-3 rel. diff).
    c = math.sqrt(2.0 / math.pi)
    return 0.5 * x * (1.0 + jnp.tanh(c * (x + 0.044715 * x * x * x)))


def _fwd_kernel(ids_lab_ref, bias2d_ref, small_ref, big_ref,
                logits_ref, loss_ref):
    ids = ids_lab_ref[:, 0:1]                                     # (BS, 1) i32
    labels = ids_lab_ref[:, 1:2]                                  # (BS, 1) i32

    # ---- embeddings: word gather via one-hot matmul; pos+type is a constant ----
    word_oh = (jax.lax.broadcasted_iota(jnp.int32, (BS, VOCAB), 1)
               == ids).astype(jnp.float32)                        # (BS, VOCAB)
    wemb = big_ref[W_WORD:W_WORD + VOCAB, 0:HIDDEN]               # (VOCAB, H)
    pt_const = small_ref[ROW_PT:ROW_PT + BS, 0:HIDDEN]            # (BS, H)
    emb = jnp.dot(word_oh, wemb, preferred_element_type=jnp.float32) + pt_const
    x = _layer_norm(emb,
                    small_ref[ROW_EG:ROW_EG + 1, 0:HIDDEN],
                    small_ref[ROW_EB:ROW_EB + 1, 0:HIDDEN])       # (BS, H)

    bias2d = bias2d_ref[...]                                      # (BS, BS) additive

    # ---- transformer layers (statically unrolled; everything stays in VMEM) ----
    for l in range(N_LAYERS):
        sb = ROW_L0 + l * SMALL_PER_LAYER
        wb = W_L0 + l * W_PER_LAYER

        wqkv = big_ref[wb:wb + HIDDEN, 0:3 * HIDDEN]              # (H, 3H)
        bqkv = small_ref[sb + 0:sb + 1, 0:3 * HIDDEN]             # (1, 3H)
        qkv = jnp.dot(x, wqkv, preferred_element_type=jnp.float32) + bqkv
        q = qkv[:, 0:HIDDEN]              # 1/sqrt(Dh) already folded into wqkv
        k = qkv[:, HIDDEN:2 * HIDDEN]
        v = qkv[:, 2 * HIDDEN:3 * HIDDEN]
        kT = k.T                                                  # one vxpose / layer

        attn_out = None
        for h in range(N_HEADS):
            lo, hi = h * HEAD_DIM, (h + 1) * HEAD_DIM
            qh = q[:, lo:hi]                                      # (BS, Dh)
            kTh = kT[lo:hi, :]                                    # sublane slice
            vh = v[:, lo:hi]
            s = jnp.dot(qh, kTh, preferred_element_type=jnp.float32) + bias2d
            m = jnp.max(s, axis=-1, keepdims=True)
            p = jnp.exp(s - m)
            denom = jnp.sum(p, axis=-1, keepdims=True)
            ctx_h = jnp.dot(p, vh, preferred_element_type=jnp.float32)
            ctx_h = ctx_h * pl.reciprocal(denom, approx=True)     # deferred softmax norm
            wo_h = big_ref[wb + HIDDEN + lo:wb + HIDDEN + hi, 0:HIDDEN]  # (Dh, H)
            contrib = jnp.dot(ctx_h, wo_h, preferred_element_type=jnp.float32)
            attn_out = contrib if attn_out is None else attn_out + contrib
        attn_out = attn_out + small_ref[sb + 1:sb + 2, 0:HIDDEN]  # + bo

        x = _layer_norm(x + attn_out,
                        small_ref[sb + 2:sb + 3, 0:HIDDEN],
                        small_ref[sb + 3:sb + 4, 0:HIDDEN])

        w1 = big_ref[wb + 2 * HIDDEN:wb + 3 * HIDDEN, 0:INTER]    # (H, INTER)
        b1 = small_ref[sb + 4:sb + 5, 0:INTER]
        h1 = _gelu(jnp.dot(x, w1, preferred_element_type=jnp.float32) + b1)
        w2 = big_ref[wb + 3 * HIDDEN:wb + 3 * HIDDEN + INTER, 0:HIDDEN]  # (INTER, H)
        b2 = small_ref[sb + 5:sb + 6, 0:HIDDEN]
        h2 = jnp.dot(h1, w2, preferred_element_type=jnp.float32) + b2
        x = _layer_norm(x + h2,
                        small_ref[sb + 6:sb + 7, 0:HIDDEN],
                        small_ref[sb + 7:sb + 8, 0:HIDDEN])

    # ---- classifier (lane-dense, padded cols get bias NEG; dropout = identity) ----
    wcls = big_ref[W_CLS:W_CLS + HIDDEN, 0:CLS_PAD]               # (H, 128)
    bcls = small_ref[ROW_BCLS:ROW_BCLS + 1, 0:CLS_PAD]            # (1, 128)
    logits = jnp.dot(x, wcls, preferred_element_type=jnp.float32) + bcls
    logits_ref[...] = logits

    # ---- cross entropy (ignore_index = -100), fully reduced in-kernel ----
    m = jnp.max(logits, axis=-1, keepdims=True)
    lse = jnp.log(jnp.sum(jnp.exp(logits - m), axis=-1, keepdims=True)) + m
    col = jax.lax.broadcasted_iota(jnp.int32, (BS, CLS_PAD), 1)
    onehot = (col == labels).astype(jnp.float32)
    label_logit = jnp.sum(logits * onehot, axis=-1, keepdims=True)
    valid = (labels != -100).astype(jnp.float32)
    loss_sum = jnp.sum((lse - label_logit) * valid, keepdims=True)     # (1, 1)
    valid_sum = jnp.sum(valid, keepdims=True)                          # (1, 1)
    # TODO(synk): PyTorch returns NaN when every label is -100; here it is 0.
    loss_ref[...] = loss_sum * pl.reciprocal(jnp.maximum(valid_sum, 1.0),
                                             approx=True)


def _fused_forward(ids_lab, bias2d, small, big):
    return pl.pallas_call(
        _fwd_kernel,
        out_shape=(jax.ShapeDtypeStruct((BS, CLS_PAD), jnp.float32),
                   jax.ShapeDtypeStruct((1, 1), jnp.float32)),
        in_specs=[_VMEM] * 4,
        out_specs=(_VMEM, _VMEM),
    )(ids_lab, bias2d, small, big)


# ---------------------------- parameters ---------------------------------------
def init_params(key):
    keys = iter(jax.random.split(key, 64))

    def nrm(shape):
        return 0.02 * jax.random.normal(next(keys), shape, jnp.float32)

    small = jnp.zeros((SMALL_ROWS_PAD, 128), jnp.float32)
    big = jnp.zeros((BIG_ROWS, 128), jnp.float32)

    # embeddings
    word_emb = nrm((VOCAB, HIDDEN))
    pos_emb = nrm((MAX_POS, HIDDEN))
    type_emb = nrm((2, HIDDEN))
    # positions are always 0..S-1 tiled over batch; token_type_ids == 0
    pt_const = jnp.tile(pos_emb[:S], (B, 1)) + type_emb[0:1, :]        # (BS, H)

    big = big.at[W_WORD:W_WORD + VOCAB, 0:HIDDEN].set(word_emb)
    small = small.at[ROW_PT:ROW_PT + BS, 0:HIDDEN].set(pt_const)
    small = small.at[ROW_EG, 0:HIDDEN].set(1.0)                        # emb LN gamma
    # emb LN beta stays zero

    # classifier: weights only in the first NUM_LABELS columns; padded bias = NEG
    big = big.at[W_CLS:W_CLS + HIDDEN, 0:NUM_LABELS].set(nrm((HIDDEN, NUM_LABELS)))
    small = small.at[ROW_BCLS, NUM_LABELS:CLS_PAD].set(NEG)

    scale = 1.0 / math.sqrt(HEAD_DIM)
    for l in range(N_LAYERS):
        wb = W_L0 + l * W_PER_LAYER
        sb = ROW_L0 + l * SMALL_PER_LAYER
        wq, wk, wv = nrm((HIDDEN, HIDDEN)), nrm((HIDDEN, HIDDEN)), nrm((HIDDEN, HIDDEN))
        wqkv = jnp.concatenate([wq * scale, wk, wv], axis=1)           # scale folded
        big = big.at[wb:wb + HIDDEN, 0:3 * HIDDEN].set(wqkv)
        big = big.at[wb + HIDDEN:wb + 2 * HIDDEN, 0:HIDDEN].set(nrm((HIDDEN, HIDDEN)))
        big = big.at[wb + 2 * HIDDEN:wb + 3 * HIDDEN, 0:INTER].set(nrm((HIDDEN, INTER)))
        big = big.at[wb + 3 * HIDDEN:wb + 3 * HIDDEN + INTER, 0:HIDDEN].set(
            nrm((INTER, HIDDEN)))
        # all biases stay zero; LN gammas = 1
        small = small.at[sb + 2, 0:HIDDEN].set(1.0)                    # ln1 gamma
        small = small.at[sb + 6, 0:HIDDEN].set(1.0)                    # ln2 gamma

    return {"small": small, "big": big}


# ---------------------------- forward (== EntityExtractionModel.forward) -------
def forward(params, input_ids, attention_mask, labels=None):
    Bx, Sx = input_ids.shape
    bs = Bx * Sx

    ids = input_ids.reshape(bs).astype(jnp.int32)
    if labels is None:
        lab = jnp.full((bs,), -100, jnp.int32)
    else:
        lab = labels.reshape(bs).astype(jnp.int32)
    ids_lab = jnp.stack([ids, lab], axis=1)                            # (bs, 2) i32

    # additive attention bias: block-diagonal over batch, NEG on padded keys
    key_bias = ((1.0 - attention_mask.astype(jnp.float32)) * NEG).reshape(1, bs)
    batch_ids = jnp.repeat(jnp.arange(Bx, dtype=jnp.int32), Sx)
    same_batch = batch_ids[:, None] == batch_ids[None, :]
    bias2d = jnp.where(same_batch, jnp.broadcast_to(key_bias, (bs, bs)), NEG)

    logits_pad, loss11 = _fused_forward(ids_lab, bias2d,
                                        params["small"], params["big"])

    logits = logits_pad[:, :NUM_LABELS].reshape(Bx, Sx, NUM_LABELS)
    loss = loss11[0, 0] if labels is not None else None
    return loss, logits


# ---------------------------- demo ---------------------------------------------
if __name__ == "__main__":
    params = init_params(jax.random.PRNGKey(0))

    kid, klab = jax.random.split(jax.random.PRNGKey(0), 2)
    input_ids = jax.random.randint(kid, (B, S), 0, VOCAB, dtype=jnp.int32)
    attention_mask = jnp.ones((B, S), jnp.int32).at[:, 6:].set(0)      # pad tail
    labels = jax.random.randint(klab, (B, S), 0, NUM_LABELS, dtype=jnp.int32)
    labels = jnp.where(attention_mask == 1, labels, -100)              # ignore pads

    fwd = jax.jit(functools.partial(forward, params))
    loss, logits = fwd(input_ids, attention_mask, labels)
    jax.block_until_ready((loss, logits))

    assert logits.shape == (B, S, NUM_LABELS)
    assert loss.shape == ()
    assert bool(jnp.isfinite(loss))
    print("KERNEL_OK")
</pallas_src>

<mosaic_0001>
module attributes {stable_mosaic.version = 11 : i64} {
  func.func @_fwd_kernel(%arg0: memref<16x2xi32, #tpu.memory_space<vmem>>, %arg1: memref<16x16xf32, #tpu.memory_space<vmem>>, %arg2: memref<40x128xf32, #tpu.memory_space<vmem>>, %arg3: memref<608x128xf32, #tpu.memory_space<vmem>>, %arg4: memref<16x128xf32, #tpu.memory_space<vmem>>, %arg5: memref<1x1xf32, #tpu.memory_space<vmem>>) attributes {dimension_semantics = [], scalar_prefetch = 0 : i64, scratch_operands = 0 : i64, tpu.core_type = #tpu.core_type<tc>} {
    %c0 = arith.constant 0 : index
    %c0_0 = arith.constant 0 : index
    %0 = vector.load %arg0[%c0, %c0_0] : memref<16x2xi32, #tpu.memory_space<vmem>>, vector<16x1xi32>
    %c0_1 = arith.constant 0 : index
    %c1 = arith.constant 1 : index
    %1 = vector.load %arg0[%c0_1, %c1] : memref<16x2xi32, #tpu.memory_space<vmem>>, vector<16x1xi32>
    %2 = tpu.iota {dimensions = array<i32: 1>} : vector<16x128xi32>
    %3 = vector.broadcast %0 : vector<16x1xi32> to vector<16x128xi32>
    %4 = arith.cmpi eq, %2, %3 : vector<16x128xi32>
    %5 = arith.extui %4 : vector<16x128xi1> to vector<16x128xi32>
    %6 = arith.sitofp %5 : vector<16x128xi32> to vector<16x128xf32>
    %c0_2 = arith.constant 0 : index
    %c0_3 = arith.constant 0 : index
    %7 = vector.load %arg3[%c0_2, %c0_3] : memref<608x128xf32, #tpu.memory_space<vmem>>, vector<128x32xf32>
    %c2 = arith.constant 2 : index
    %c0_4 = arith.constant 0 : index
    %8 = vector.load %arg2[%c2, %c0_4] : memref<40x128xf32, #tpu.memory_space<vmem>>, vector<16x32xf32>
    %cst = arith.constant dense<0.000000e+00> : vector<16x32xf32>
    %9 = tpu.matmul %6, %7, %cst {dimension_numbers = #tpu.dot_dimension_numbers<[1], [0], [0], [1], [0, 0, 1, 1], [], []>} : vector<16x128xf32>, vector<128x32xf32>, vector<16x32xf32> -> vector<16x32xf32>
    %10 = arith.addf %9, %8 : vector<16x32xf32>
    %c0_5 = arith.constant 0 : index
    %c0_6 = arith.constant 0 : index
    %11 = vector.load %arg2[%c0_5, %c0_6] : memref<40x128xf32, #tpu.memory_space<vmem>>, vector<1x32xf32>
    %c1_7 = arith.constant 1 : index
    %c0_8 = arith.constant 0 : index
    %12 = vector.load %arg2[%c1_7, %c0_8] : memref<40x128xf32, #tpu.memory_space<vmem>>, vector<1x32xf32>
    %cst_9 = arith.constant dense<0.000000e+00> : vector<16xf32>
    %13 = vector.multi_reduction <add>, %10, %cst_9 [1] : vector<16x32xf32> to vector<16xf32>
    %14 = vector.shape_cast %13 : vector<16xf32> to vector<16x1xf32>
    %cst_10 = arith.constant 3.200000e+01 : f32
    %15 = vector.broadcast %cst_10 : f32 to vector<16x1xf32>
    %16 = arith.divf %14, %15 : vector<16x1xf32>
    %17 = arith.mulf %10, %10 : vector<16x32xf32>
    %cst_11 = arith.constant dense<0.000000e+00> : vector<16xf32>
    %18 = vector.multi_reduction <add>, %17, %cst_11 [1] : vector<16x32xf32> to vector<16xf32>
    %19 = vector.shape_cast %18 : vector<16xf32> to vector<16x1xf32>
    %cst_12 = arith.constant 3.200000e+01 : f32
    %20 = vector.broadcast %cst_12 : f32 to vector<16x1xf32>
    %21 = arith.divf %19, %20 : vector<16x1xf32>
    %22 = arith.mulf %16, %16 : vector<16x1xf32>
    %23 = arith.subf %21, %22 : vector<16x1xf32>
    %24 = vector.broadcast %16 : vector<16x1xf32> to vector<16x32xf32>
    %25 = arith.subf %10, %24 : vector<16x32xf32>
    %cst_13 = arith.constant 9.99999996E-13 : f32
    %26 = vector.broadcast %cst_13 : f32 to vector<16x1xf32>
    %27 = arith.addf %23, %26 : vector<16x1xf32>
    %28 = math.rsqrt %27 : vector<16x1xf32>
    %29 = vector.broadcast %28 : vector<16x1xf32> to vector<16x32xf32>
    %30 = arith.mulf %25, %29 : vector<16x32xf32>
    %31 = vector.broadcast %11 : vector<1x32xf32> to vector<16x32xf32>
    %32 = arith.mulf %30, %31 : vector<16x32xf32>
    %33 = vector.broadcast %12 : vector<1x32xf32> to vector<16x32xf32>
    %34 = arith.addf %32, %33 : vector<16x32xf32>
    %c0_14 = arith.constant 0 : index
    %c0_15 = arith.constant 0 : index
    %35 = vector.load %arg1[%c0_14, %c0_15] : memref<16x16xf32, #tpu.memory_space<vmem>>, vector<16x16xf32>
    %c160 = arith.constant 160 : index
    %c0_16 = arith.constant 0 : index
    %36 = vector.load %arg3[%c160, %c0_16] : memref<608x128xf32, #tpu.memory_space<vmem>>, vector<32x96xf32>
    %c19 = arith.constant 19 : index
    %c0_17 = arith.constant 0 : index
    %37 = vector.load %arg2[%c19, %c0_17] : memref<40x128xf32, #tpu.memory_space<vmem>>, vector<1x96xf32>
    %cst_18 = arith.constant dense<0.000000e+00> : vector<16x96xf32>
    %38 = tpu.matmul %34, %36, %cst_18 {dimension_numbers = #tpu.dot_dimension_numbers<[1], [0], [0], [1], [0, 0, 1, 1], [], []>} : vector<16x32xf32>, vector<32x96xf32>, vector<16x96xf32> -> vector<16x96xf32>
    %39 = vector.broadcast %37 : vector<1x96xf32> to vector<16x96xf32>
    %40 = arith.addf %38, %39 : vector<16x96xf32>
    %41 = vector.extract_strided_slice %40 {offsets = [0, 0], sizes = [16, 32], strides = [1, 1]} : vector<16x96xf32> to vector<16x32xf32>
    %42 = vector.extract_strided_slice %40 {offsets = [0, 32], sizes = [16, 32], strides = [1, 1]} : vector<16x96xf32> to vector<16x32xf32>
    %43 = vector.extract_strided_slice %40 {offsets = [0, 64], sizes = [16, 32], strides = [1, 1]} : vector<16x96xf32> to vector<16x32xf32>
    %44 = tpu.transpose %42, [1, 0] : vector<16x32xf32> -> vector<32x16xf32>
    %45 = vector.extract_strided_slice %41 {offsets = [0, 0], sizes = [16, 8], strides = [1, 1]} : vector<16x32xf32> to vector<16x8xf32>
    %46 = vector.extract_strided_slice %44 {offsets = [0, 0], sizes = [8, 16], strides = [1, 1]} : vector<32x16xf32> to vector<8x16xf32>
    %47 = vector.extract_strided_slice %43 {offsets = [0, 0], sizes = [16, 8], strides = [1, 1]} : vector<16x32xf32> to vector<16x8xf32>
    %cst_19 = arith.constant dense<0.000000e+00> : vector<16x16xf32>
    %48 = tpu.matmul %45, %46, %cst_19 {dimension_numbers = #tpu.dot_dimension_numbers<[1], [0], [0], [1], [0, 0, 1, 1], [], []>} : vector<16x8xf32>, vector<8x16xf32>, vector<16x16xf32> -> vector<16x16xf32>
    %49 = arith.addf %48, %35 : vector<16x16xf32>
    %cst_20 = arith.constant dense<0xFF800000> : vector<16xf32>
    %50 = vector.multi_reduction <maximumf>, %49, %cst_20 [1] : vector<16x16xf32> to vector<16xf32>
    %51 = vector.shape_cast %50 : vector<16xf32> to vector<16x1xf32>
    %52 = vector.broadcast %51 : vector<16x1xf32> to vector<16x16xf32>
    %53 = arith.subf %49, %52 : vector<16x16xf32>
    %54 = math.exp %53 : vector<16x16xf32>
    %cst_21 = arith.constant dense<0.000000e+00> : vector<16xf32>
    %55 = vector.multi_reduction <add>, %54, %cst_21 [1] : vector<16x16xf32> to vector<16xf32>
    %56 = vector.shape_cast %55 : vector<16xf32> to vector<16x1xf32>
    %cst_22 = arith.constant dense<0.000000e+00> : vector<16x8xf32>
    %57 = tpu.matmul %54, %47, %cst_22 {dimension_numbers = #tpu.dot_dimension_numbers<[1], [0], [0], [1], [0, 0, 1, 1], [], []>} : vector<16x16xf32>, vector<16x8xf32>, vector<16x8xf32> -> vector<16x8xf32>
    %58 = tpu.reciprocal %56 {approx = true} : vector<16x1xf32> -> vector<16x1xf32>
    %59 = vector.broadcast %58 : vector<16x1xf32> to vector<16x8xf32>
    %60 = arith.mulf %57, %59 : vector<16x8xf32>
    %c192 = arith.constant 192 : index
    %c0_23 = arith.constant 0 : index
    %61 = vector.load %arg3[%c192, %c0_23] : memref<608x128xf32, #tpu.memory_space<vmem>>, vector<8x32xf32>
    %cst_24 = arith.constant dense<0.000000e+00> : vector<16x32xf32>
    %62 = tpu.matmul %60, %61, %cst_24 {dimension_numbers = #tpu.dot_dimension_numbers<[1], [0], [0], [1], [0, 0, 1, 1], [], []>} : vector<16x8xf32>, vector<8x32xf32>, vector<16x32xf32> -> vector<16x32xf32>
    %63 = vector.extract_strided_slice %41 {offsets = [0, 8], sizes = [16, 8], strides = [1, 1]} : vector<16x32xf32> to vector<16x8xf32>
    %64 = vector.extract_strided_slice %44 {offsets = [8, 0], sizes = [8, 16], strides = [1, 1]} : vector<32x16xf32> to vector<8x16xf32>
    %65 = vector.extract_strided_slice %43 {offsets = [0, 8], sizes = [16, 8], strides = [1, 1]} : vector<16x32xf32> to vector<16x8xf32>
    %cst_25 = arith.constant dense<0.000000e+00> : vector<16x16xf32>
    %66 = tpu.matmul %63, %64, %cst_25 {dimension_numbers = #tpu.dot_dimension_numbers<[1], [0], [0], [1], [0, 0, 1, 1], [], []>} : vector<16x8xf32>, vector<8x16xf32>, vector<16x16xf32> -> vector<16x16xf32>
    %67 = arith.addf %66, %35 : vector<16x16xf32>
    %cst_26 = arith.constant dense<0xFF800000> : vector<16xf32>
    %68 = vector.multi_reduction <maximumf>, %67, %cst_26 [1] : vector<16x16xf32> to vector<16xf32>
    %69 = vector.shape_cast %68 : vector<16xf32> to vector<16x1xf32>
    %70 = vector.broadcast %69 : vector<16x1xf32> to vector<16x16xf32>
    %71 = arith.subf %67, %70 : vector<16x16xf32>
    %72 = math.exp %71 : vector<16x16xf32>
    %cst_27 = arith.constant dense<0.000000e+00> : vector<16xf32>
    %73 = vector.multi_reduction <add>, %72, %cst_27 [1] : vector<16x16xf32> to vector<16xf32>
    %74 = vector.shape_cast %73 : vector<16xf32> to vector<16x1xf32>
    %cst_28 = arith.constant dense<0.000000e+00> : vector<16x8xf32>
    %75 = tpu.matmul %72, %65, %cst_28 {dimension_numbers = #tpu.dot_dimension_numbers<[1], [0], [0], [1], [0, 0, 1, 1], [], []>} : vector<16x16xf32>, vector<16x8xf32>, vector<16x8xf32> -> vector<16x8xf32>
    %76 = tpu.reciprocal %74 {approx = true} : vector<16x1xf32> -> vector<16x1xf32>
    %77 = vector.broadcast %76 : vector<16x1xf32> to vector<16x8xf32>
    %78 = arith.mulf %75, %77 : vector<16x8xf32>
    %c200 = arith.constant 200 : index
    %c0_29 = arith.constant 0 : index
    %79 = vector.load %arg3[%c200, %c0_29] : memref<608x128xf32, #tpu.memory_space<vmem>>, vector<8x32xf32>
    %cst_30 = arith.constant dense<0.000000e+00> : vector<16x32xf32>
    %80 = tpu.matmul %78, %79, %cst_30 {dimension_numbers = #tpu.dot_dimension_numbers<[1], [0], [0], [1], [0, 0, 1, 1], [], []>} : vector<16x8xf32>, vector<8x32xf32>, vector<16x32xf32> -> vector<16x32xf32>
    %81 = arith.addf %62, %80 : vector<16x32xf32>
    %82 = vector.extract_strided_slice %41 {offsets = [0, 16], sizes = [16, 8], strides = [1, 1]} : vector<16x32xf32> to vector<16x8xf32>
    %83 = vector.extract_strided_slice %44 {offsets = [16, 0], sizes = [8, 16], strides = [1, 1]} : vector<32x16xf32> to vector<8x16xf32>
    %84 = vector.extract_strided_slice %43 {offsets = [0, 16], sizes = [16, 8], strides = [1, 1]} : vector<16x32xf32> to vector<16x8xf32>
    %cst_31 = arith.constant dense<0.000000e+00> : vector<16x16xf32>
    %85 = tpu.matmul %82, %83, %cst_31 {dimension_numbers = #tpu.dot_dimension_numbers<[1], [0], [0], [1], [0, 0, 1, 1], [], []>} : vector<16x8xf32>, vector<8x16xf32>, vector<16x16xf32> -> vector<16x16xf32>
    %86 = arith.addf %85, %35 : vector<16x16xf32>
    %cst_32 = arith.constant dense<0xFF800000> : vector<16xf32>
    %87 = vector.multi_reduction <maximumf>, %86, %cst_32 [1] : vector<16x16xf32> to vector<16xf32>
    %88 = vector.shape_cast %87 : vector<16xf32> to vector<16x1xf32>
    %89 = vector.broadcast %88 : vector<16x1xf32> to vector<16x16xf32>
    %90 = arith.subf %86, %89 : vector<16x16xf32>
    %91 = math.exp %90 : vector<16x16xf32>
    %cst_33 = arith.constant dense<0.000000e+00> : vector<16xf32>
    %92 = vector.multi_reduction <add>, %91, %cst_33 [1] : vector<16x16xf32> to vector<16xf32>
    %93 = vector.shape_cast %92 : vector<16xf32> to vector<16x1xf32>
    %cst_34 = arith.constant dense<0.000000e+00> : vector<16x8xf32>
    %94 = tpu.matmul %91, %84, %cst_34 {dimension_numbers = #tpu.dot_dimension_numbers<[1], [0], [0], [1], [0, 0, 1, 1], [], []>} : vector<16x16xf32>, vector<16x8xf32>, vector<16x8xf32> -> vector<16x8xf32>
    %95 = tpu.reciprocal %93 {approx = true} : vector<16x1xf32> -> vector<16x1xf32>
    %96 = vector.broadcast %95 : vector<16x1xf32> to vector<16x8xf32>
    %97 = arith.mulf %94, %96 : vector<16x8xf32>
    %c208 = arith.constant 208 : index
    %c0_35 = arith.constant 0 : index
    %98 = vector.load %arg3[%c208, %c0_35] : memref<608x128xf32, #tpu.memory_space<vmem>>, vector<8x32xf32>
    %cst_36 = arith.constant dense<0.000000e+00> : vector<16x32xf32>
    %99 = tpu.matmul %97, %98, %cst_36 {dimension_numbers = #tpu.dot_dimension_numbers<[1], [0], [0], [1], [0, 0, 1, 1], [], []>} : vector<16x8xf32>, vector<8x32xf32>, vector<16x32xf32> -> vector<16x32xf32>
    %100 = arith.addf %81, %99 : vector<16x32xf32>
    %101 = vector.extract_strided_slice %41 {offsets = [0, 24], sizes = [16, 8], strides = [1, 1]} : vector<16x32xf32> to vector<16x8xf32>
    %102 = vector.extract_strided_slice %44 {offsets = [24, 0], sizes = [8, 16], strides = [1, 1]} : vector<32x16xf32> to vector<8x16xf32>
    %103 = vector.extract_strided_slice %43 {offsets = [0, 24], sizes = [16, 8], strides = [1, 1]} : vector<16x32xf32> to vector<16x8xf32>
    %cst_37 = arith.constant dense<0.000000e+00> : vector<16x16xf32>
    %104 = tpu.matmul %101, %102, %cst_37 {dimension_numbers = #tpu.dot_dimension_numbers<[1], [0], [0], [1], [0, 0, 1, 1], [], []>} : vector<16x8xf32>, vector<8x16xf32>, vector<16x16xf32> -> vector<16x16xf32>
    %105 = arith.addf %104, %35 : vector<16x16xf32>
    %cst_38 = arith.constant dense<0xFF800000> : vector<16xf32>
    %106 = vector.multi_reduction <maximumf>, %105, %cst_38 [1] : vector<16x16xf32> to vector<16xf32>
    %107 = vector.shape_cast %106 : vector<16xf32> to vector<16x1xf32>
    %108 = vector.broadcast %107 : vector<16x1xf32> to vector<16x16xf32>
    %109 = arith.subf %105, %108 : vector<16x16xf32>
    %110 = math.exp %109 : vector<16x16xf32>
    %cst_39 = arith.constant dense<0.000000e+00> : vector<16xf32>
    %111 = vector.multi_reduction <add>, %110, %cst_39 [1] : vector<16x16xf32> to vector<16xf32>
    %112 = vector.shape_cast %111 : vector<16xf32> to vector<16x1xf32>
    %cst_40 = arith.constant dense<0.000000e+00> : vector<16x8xf32>
    %113 = tpu.matmul %110, %103, %cst_40 {dimension_numbers = #tpu.dot_dimension_numbers<[1], [0], [0], [1], [0, 0, 1, 1], [], []>} : vector<16x16xf32>, vector<16x8xf32>, vector<16x8xf32> -> vector<16x8xf32>
    %114 = tpu.reciprocal %112 {approx = true} : vector<16x1xf32> -> vector<16x1xf32>
    %115 = vector.broadcast %114 : vector<16x1xf32> to vector<16x8xf32>
    %116 = arith.mulf %113, %115 : vector<16x8xf32>
    %c216 = arith.constant 216 : index
    %c0_41 = arith.constant 0 : index
    %117 = vector.load %arg3[%c216, %c0_41] : memref<608x128xf32, #tpu.memory_space<vmem>>, vector<8x32xf32>
    %cst_42 = arith.constant dense<0.000000e+00> : vector<16x32xf32>
    %118 = tpu.matmul %116, %117, %cst_42 {dimension_numbers = #tpu.dot_dimension_numbers<[1], [0], [0], [1], [0, 0, 1, 1], [], []>} : vector<16x8xf32>, vector<8x32xf32>, vector<16x32xf32> -> vector<16x32xf32>
    %119 = arith.addf %100, %118 : vector<16x32xf32>
    %c20 = arith.constant 20 : index
    %c0_43 = arith.constant 0 : index
    %120 = vector.load %arg2[%c20, %c0_43] : memref<40x128xf32, #tpu.memory_space<vmem>>, vector<1x32xf32>
    %121 = vector.broadcast %120 : vector<1x32xf32> to vector<16x32xf32>
    %122 = arith.addf %119, %121 : vector<16x32xf32>
    %123 = arith.addf %34, %122 : vector<16x32xf32>
    %c21 = arith.constant 21 : index
    %c0_44 = arith.constant 0 : index
    %124 = vector.load %arg2[%c21, %c0_44] : memref<40x128xf32, #tpu.memory_space<vmem>>, vector<1x32xf32>
    %c22 = arith.constant 22 : index
    %c0_45 = arith.constant 0 : index
    %125 = vector.load %arg2[%c22, %c0_45] : memref<40x128xf32, #tpu.memory_space<vmem>>, vector<1x32xf32>
    %cst_46 = arith.constant dense<0.000000e+00> : vector<16xf32>
    %126 = vector.multi_reduction <add>, %123, %cst_46 [1] : vector<16x32xf32> to vector<16xf32>
    %127 = vector.shape_cast %126 : vector<16xf32> to vector<16x1xf32>
    %cst_47 = arith.constant 3.200000e+01 : f32
    %128 = vector.broadcast %cst_47 : f32 to vector<16x1xf32>
    %129 = arith.divf %127, %128 : vector<16x1xf32>
    %130 = arith.mulf %123, %123 : vector<16x32xf32>
    %cst_48 = arith.constant dense<0.000000e+00> : vector<16xf32>
    %131 = vector.multi_reduction <add>, %130, %cst_48 [1] : vector<16x32xf32> to vector<16xf32>
    %132 = vector.shape_cast %131 : vector<16xf32> to vector<16x1xf32>
    %cst_49 = arith.constant 3.200000e+01 : f32
    %133 = vector.broadcast %cst_49 : f32 to vector<16x1xf32>
    %134 = arith.divf %132, %133 : vector<16x1xf32>
    %135 = arith.mulf %129, %129 : vector<16x1xf32>
    %136 = arith.subf %134, %135 : vector<16x1xf32>
    %137 = vector.broadcast %129 : vector<16x1xf32> to vector<16x32xf32>
    %138 = arith.subf %123, %137 : vector<16x32xf32>
    %cst_50 = arith.constant 9.99999996E-13 : f32
    %139 = vector.broadcast %cst_50 : f32 to vector<16x1xf32>
    %140 = arith.addf %136, %139 : vector<16x1xf32>
    %141 = math.rsqrt %140 : vector<16x1xf32>
    %142 = vector.broadcast %141 : vector<16x1xf32> to vector<16x32xf32>
    %143 = arith.mulf %138, %142 : vector<16x32xf32>
    %144 = vector.broadcast %124 : vector<1x32xf32> to vector<16x32xf32>
    %145 = arith.mulf %143, %144 : vector<16x32xf32>
    %146 = vector.broadcast %125 : vector<1x32xf32> to vector<16x32xf32>
    %147 = arith.addf %145, %146 : vector<16x32xf32>
    %c224 = arith.constant 224 : index
    %c0_51 = arith.constant 0 : index
    %148 = vector.load %arg3[%c224, %c0_51] : memref<608x128xf32, #tpu.memory_space<vmem>>, vector<32x128xf32>
    %c23 = arith.constant 23 : index
    %c0_52 = arith.constant 0 : index
    %149 = vector.load %arg2[%c23, %c0_52] : memref<40x128xf32, #tpu.memory_space<vmem>>, vector<1x128xf32>
    %cst_53 = arith.constant dense<0.000000e+00> : vector<16x128xf32>
    %150 = tpu.matmul %147, %148, %cst_53 {dimension_numbers = #tpu.dot_dimension_numbers<[1], [0], [0], [1], [0, 0, 1, 1], [], []>} : vector<16x32xf32>, vector<32x128xf32>, vector<16x128xf32> -> vector<16x128xf32>
    %151 = vector.broadcast %149 : vector<1x128xf32> to vector<16x128xf32>
    %152 = arith.addf %150, %151 : vector<16x128xf32>
    %cst_54 = arith.constant 5.000000e-01 : f32
    %153 = vector.broadcast %cst_54 : f32 to vector<16x128xf32>
    %154 = arith.mulf %153, %152 : vector<16x128xf32>
    %cst_55 = arith.constant 4.471500e-02 : f32
    %155 = vector.broadcast %cst_55 : f32 to vector<16x128xf32>
    %156 = arith.mulf %155, %152 : vector<16x128xf32>
    %157 = arith.mulf %156, %152 : vector<16x128xf32>
    %158 = arith.mulf %157, %152 : vector<16x128xf32>
    %159 = arith.addf %152, %158 : vector<16x128xf32>
    %cst_56 = arith.constant 0.797884583 : f32
    %160 = vector.broadcast %cst_56 : f32 to vector<16x128xf32>
    %161 = arith.mulf %160, %159 : vector<16x128xf32>
    %162 = math.tanh %161 : vector<16x128xf32>
    %cst_57 = arith.constant 1.000000e+00 : f32
    %163 = vector.broadcast %cst_57 : f32 to vector<16x128xf32>
    %164 = arith.addf %163, %162 : vector<16x128xf32>
    %165 = arith.mulf %154, %164 : vector<16x128xf32>
    %c256 = arith.constant 256 : index
    %c0_58 = arith.constant 0 : index
    %166 = vector.load %arg3[%c256, %c0_58] : memref<608x128xf32, #tpu.memory_space<vmem>>, vector<128x32xf32>
    %c24 = arith.constant 24 : index
    %c0_59 = arith.constant 0 : index
    %167 = vector.load %arg2[%c24, %c0_59] : memref<40x128xf32, #tpu.memory_space<vmem>>, vector<1x32xf32>
    %cst_60 = arith.constant dense<0.000000e+00> : vector<16x32xf32>
    %168 = tpu.matmul %165, %166, %cst_60 {dimension_numbers = #tpu.dot_dimension_numbers<[1], [0], [0], [1], [0, 0, 1, 1], [], []>} : vector<16x128xf32>, vector<128x32xf32>, vector<16x32xf32> -> vector<16x32xf32>
    %169 = vector.broadcast %167 : vector<1x32xf32> to vector<16x32xf32>
    %170 = arith.addf %168, %169 : vector<16x32xf32>
    %171 = arith.addf %147, %170 : vector<16x32xf32>
    %c25 = arith.constant 25 : index
    %c0_61 = arith.constant 0 : index
    %172 = vector.load %arg2[%c25, %c0_61] : memref<40x128xf32, #tpu.memory_space<vmem>>, vector<1x32xf32>
    %c26 = arith.constant 26 : index
    %c0_62 = arith.constant 0 : index
    %173 = vector.load %arg2[%c26, %c0_62] : memref<40x128xf32, #tpu.memory_space<vmem>>, vector<1x32xf32>
    %cst_63 = arith.constant dense<0.000000e+00> : vector<16xf32>
    %174 = vector.multi_reduction <add>, %171, %cst_63 [1] : vector<16x32xf32> to vector<16xf32>
    %175 = vector.shape_cast %174 : vector<16xf32> to vector<16x1xf32>
    %cst_64 = arith.constant 3.200000e+01 : f32
    %176 = vector.broadcast %cst_64 : f32 to vector<16x1xf32>
    %177 = arith.divf %175, %176 : vector<16x1xf32>
    %178 = arith.mulf %171, %171 : vector<16x32xf32>
    %cst_65 = arith.constant dense<0.000000e+00> : vector<16xf32>
    %179 = vector.multi_reduction <add>, %178, %cst_65 [1] : vector<16x32xf32> to vector<16xf32>
    %180 = vector.shape_cast %179 : vector<16xf32> to vector<16x1xf32>
    %cst_66 = arith.constant 3.200000e+01 : f32
    %181 = vector.broadcast %cst_66 : f32 to vector<16x1xf32>
    %182 = arith.divf %180, %181 : vector<16x1xf32>
    %183 = arith.mulf %177, %177 : vector<16x1xf32>
    %184 = arith.subf %182, %183 : vector<16x1xf32>
    %185 = vector.broadcast %177 : vector<16x1xf32> to vector<16x32xf32>
    %186 = arith.subf %171, %185 : vector<16x32xf32>
    %cst_67 = arith.constant 9.99999996E-13 : f32
    %187 = vector.broadcast %cst_67 : f32 to vector<16x1xf32>
    %188 = arith.addf %184, %187 : vector<16x1xf32>
    %189 = math.rsqrt %188 : vector<16x1xf32>
    %190 = vector.broadcast %189 : vector<16x1xf32> to vector<16x32xf32>
    %191 = arith.mulf %186, %190 : vector<16x32xf32>
    %192 = vector.broadcast %172 : vector<1x32xf32> to vector<16x32xf32>
    %193 = arith.mulf %191, %192 : vector<16x32xf32>
    %194 = vector.broadcast %173 : vector<1x32xf32> to vector<16x32xf32>
    %195 = arith.addf %193, %194 : vector<16x32xf32>
    %c384 = arith.constant 384 : index
    %c0_68 = arith.constant 0 : index
    %196 = vector.load %arg3[%c384, %c0_68] : memref<608x128xf32, #tpu.memory_space<vmem>>, vector<32x96xf32>
    %c27 = arith.constant 27 : index
    %c0_69 = arith.constant 0 : index
    %197 = vector.load %arg2[%c27, %c0_69] : memref<40x128xf32, #tpu.memory_space<vmem>>, vector<1x96xf32>
    %cst_70 = arith.constant dense<0.000000e+00> : vector<16x96xf32>
    %198 = tpu.matmul %195, %196, %cst_70 {dimension_numbers = #tpu.dot_dimension_numbers<[1], [0], [0], [1], [0, 0, 1, 1], [], []>} : vector<16x32xf32>, vector<32x96xf32>, vector<16x96xf32> -> vector<16x96xf32>
    %199 = vector.broadcast %197 : vector<1x96xf32> to vector<16x96xf32>
    %200 = arith.addf %198, %199 : vector<16x96xf32>
    %201 = vector.extract_strided_slice %200 {offsets = [0, 0], sizes = [16, 32], strides = [1, 1]} : vector<16x96xf32> to vector<16x32xf32>
    %202 = vector.extract_strided_slice %200 {offsets = [0, 32], sizes = [16, 32], strides = [1, 1]} : vector<16x96xf32> to vector<16x32xf32>
    %203 = vector.extract_strided_slice %200 {offsets = [0, 64], sizes = [16, 32], strides = [1, 1]} : vector<16x96xf32> to vector<16x32xf32>
    %204 = tpu.transpose %202, [1, 0] : vector<16x32xf32> -> vector<32x16xf32>
    %205 = vector.extract_strided_slice %201 {offsets = [0, 0], sizes = [16, 8], strides = [1, 1]} : vector<16x32xf32> to vector<16x8xf32>
    %206 = vector.extract_strided_slice %204 {offsets = [0, 0], sizes = [8, 16], strides = [1, 1]} : vector<32x16xf32> to vector<8x16xf32>
    %207 = vector.extract_strided_slice %203 {offsets = [0, 0], sizes = [16, 8], strides = [1, 1]} : vector<16x32xf32> to vector<16x8xf32>
    %cst_71 = arith.constant dense<0.000000e+00> : vector<16x16xf32>
    %208 = tpu.matmul %205, %206, %cst_71 {dimension_numbers = #tpu.dot_dimension_numbers<[1], [0], [0], [1], [0, 0, 1, 1], [], []>} : vector<16x8xf32>, vector<8x16xf32>, vector<16x16xf32> -> vector<16x16xf32>
    %209 = arith.addf %208, %35 : vector<16x16xf32>
    %cst_72 = arith.constant dense<0xFF800000> : vector<16xf32>
    %210 = vector.multi_reduction <maximumf>, %209, %cst_72 [1] : vector<16x16xf32> to vector<16xf32>
    %211 = vector.shape_cast %210 : vector<16xf32> to vector<16x1xf32>
    %212 = vector.broadcast %211 : vector<16x1xf32> to vector<16x16xf32>
    %213 = arith.subf %209, %212 : vector<16x16xf32>
    %214 = math.exp %213 : vector<16x16xf32>
    %cst_73 = arith.constant dense<0.000000e+00> : vector<16xf32>
    %215 = vector.multi_reduction <add>, %214, %cst_73 [1] : vector<16x16xf32> to vector<16xf32>
    %216 = vector.shape_cast %215 : vector<16xf32> to vector<16x1xf32>
    %cst_74 = arith.constant dense<0.000000e+00> : vector<16x8xf32>
    %217 = tpu.matmul %214, %207, %cst_74 {dimension_numbers = #tpu.dot_dimension_numbers<[1], [0], [0], [1], [0, 0, 1, 1], [], []>} : vector<16x16xf32>, vector<16x8xf32>, vector<16x8xf32> -> vector<16x8xf32>
    %218 = tpu.reciprocal %216 {approx = true} : vector<16x1xf32> -> vector<16x1xf32>
    %219 = vector.broadcast %218 : vector<16x1xf32> to vector<16x8xf32>
    %220 = arith.mulf %217, %219 : vector<16x8xf32>
    %c416 = arith.constant 416 : index
    %c0_75 = arith.constant 0 : index
    %221 = vector.load %arg3[%c416, %c0_75] : memref<608x128xf32, #tpu.memory_space<vmem>>, vector<8x32xf32>
    %cst_76 = arith.constant dense<0.000000e+00> : vector<16x32xf32>
    %222 = tpu.matmul %220, %221, %cst_76 {dimension_numbers = #tpu.dot_dimension_numbers<[1], [0], [0], [1], [0, 0, 1, 1], [], []>} : vector<16x8xf32>, vector<8x32xf32>, vector<16x32xf32> -> vector<16x32xf32>
    %223 = vector.extract_strided_slice %201 {offsets = [0, 8], sizes = [16, 8], strides = [1, 1]} : vector<16x32xf32> to vector<16x8xf32>
    %224 = vector.extract_strided_slice %204 {offsets = [8, 0], sizes = [8, 16], strides = [1, 1]} : vector<32x16xf32> to vector<8x16xf32>
    %225 = vector.extract_strided_slice %203 {offsets = [0, 8], sizes = [16, 8], strides = [1, 1]} : vector<16x32xf32> to vector<16x8xf32>
    %cst_77 = arith.constant dense<0.000000e+00> : vector<16x16xf32>
    %226 = tpu.matmul %223, %224, %cst_77 {dimension_numbers = #tpu.dot_dimension_numbers<[1], [0], [0], [1], [0, 0, 1, 1], [], []>} : vector<16x8xf32>, vector<8x16xf32>, vector<16x16xf32> -> vector<16x16xf32>
    %227 = arith.addf %226, %35 : vector<16x16xf32>
    %cst_78 = arith.constant dense<0xFF800000> : vector<16xf32>
    %228 = vector.multi_reduction <maximumf>, %227, %cst_78 [1] : vector<16x16xf32> to vector<16xf32>
    %229 = vector.shape_cast %228 : vector<16xf32> to vector<16x1xf32>
    %230 = vector.broadcast %229 : vector<16x1xf32> to vector<16x16xf32>
    %231 = arith.subf %227, %230 : vector<16x16xf32>
    %232 = math.exp %231 : vector<16x16xf32>
    %cst_79 = arith.constant dense<0.000000e+00> : vector<16xf32>
    %233 = vector.multi_reduction <add>, %232, %cst_79 [1] : vector<16x16xf32> to vector<16xf32>
    %234 = vector.shape_cast %233 : vector<16xf32> to vector<16x1xf32>
    %cst_80 = arith.constant dense<0.000000e+00> : vector<16x8xf32>
    %235 = tpu.matmul %232, %225, %cst_80 {dimension_numbers = #tpu.dot_dimension_numbers<[1], [0], [0], [1], [0, 0, 1, 1], [], []>} : vector<16x16xf32>, vector<16x8xf32>, vector<16x8xf32> -> vector<16x8xf32>
    %236 = tpu.reciprocal %234 {approx = true} : vector<16x1xf32> -> vector<16x1xf32>
    %237 = vector.broadcast %236 : vector<16x1xf32> to vector<16x8xf32>
    %238 = arith.mulf %235, %237 : vector<16x8xf32>
    %c424 = arith.constant 424 : index
    %c0_81 = arith.constant 0 : index
    %239 = vector.load %arg3[%c424, %c0_81] : memref<608x128xf32, #tpu.memory_space<vmem>>, vector<8x32xf32>
    %cst_82 = arith.constant dense<0.000000e+00> : vector<16x32xf32>
    %240 = tpu.matmul %238, %239, %cst_82 {dimension_numbers = #tpu.dot_dimension_numbers<[1], [0], [0], [1], [0, 0, 1, 1], [], []>} : vector<16x8xf32>, vector<8x32xf32>, vector<16x32xf32> -> vector<16x32xf32>
    %241 = arith.addf %222, %240 : vector<16x32xf32>
    %242 = vector.extract_strided_slice %201 {offsets = [0, 16], sizes = [16, 8], strides = [1, 1]} : vector<16x32xf32> to vector<16x8xf32>
    %243 = vector.extract_strided_slice %204 {offsets = [16, 0], sizes = [8, 16], strides = [1, 1]} : vector<32x16xf32> to vector<8x16xf32>
    %244 = vector.extract_strided_slice %203 {offsets = [0, 16], sizes = [16, 8], strides = [1, 1]} : vector<16x32xf32> to vector<16x8xf32>
    %cst_83 = arith.constant dense<0.000000e+00> : vector<16x16xf32>
    %245 = tpu.matmul %242, %243, %cst_83 {dimension_numbers = #tpu.dot_dimension_numbers<[1], [0], [0], [1], [0, 0, 1, 1], [], []>} : vector<16x8xf32>, vector<8x16xf32>, vector<16x16xf32> -> vector<16x16xf32>
    %246 = arith.addf %245, %35 : vector<16x16xf32>
    %cst_84 = arith.constant dense<0xFF800000> : vector<16xf32>
    %247 = vector.multi_reduction <maximumf>, %246, %cst_84 [1] : vector<16x16xf32> to vector<16xf32>
    %248 = vector.shape_cast %247 : vector<16xf32> to vector<16x1xf32>
    %249 = vector.broadcast %248 : vector<16x1xf32> to vector<16x16xf32>
    %250 = arith.subf %246, %249 : vector<16x16xf32>
    %251 = math.exp %250 : vector<16x16xf32>
    %cst_85 = arith.constant dense<0.000000e+00> : vector<16xf32>
    %252 = vector.multi_reduction <add>, %251, %cst_85 [1] : vector<16x16xf32> to vector<16xf32>
    %253 = vector.shape_cast %252 : vector<16xf32> to vector<16x1xf32>
    %cst_86 = arith.constant dense<0.000000e+00> : vector<16x8xf32>
    %254 = tpu.matmul %251, %244, %cst_86 {dimension_numbers = #tpu.dot_dimension_numbers<[1], [0], [0], [1], [0, 0, 1, 1], [], []>} : vector<16x16xf32>, vector<16x8xf32>, vector<16x8xf32> -> vector<16x8xf32>
    %255 = tpu.reciprocal %253 {approx = true} : vector<16x1xf32> -> vector<16x1xf32>
    %256 = vector.broadcast %255 : vector<16x1xf32> to vector<16x8xf32>
    %257 = arith.mulf %254, %256 : vector<16x8xf32>
    %c432 = arith.constant 432 : index
    %c0_87 = arith.constant 0 : index
    %258 = vector.load %arg3[%c432, %c0_87] : memref<608x128xf32, #tpu.memory_space<vmem>>, vector<8x32xf32>
    %cst_88 = arith.constant dense<0.000000e+00> : vector<16x32xf32>
    %259 = tpu.matmul %257, %258, %cst_88 {dimension_numbers = #tpu.dot_dimension_numbers<[1], [0], [0], [1], [0, 0, 1, 1], [], []>} : vector<16x8xf32>, vector<8x32xf32>, vector<16x32xf32> -> vector<16x32xf32>
    %260 = arith.addf %241, %259 : vector<16x32xf32>
    %261 = vector.extract_strided_slice %201 {offsets = [0, 24], sizes = [16, 8], strides = [1, 1]} : vector<16x32xf32> to vector<16x8xf32>
    %262 = vector.extract_strided_slice %204 {offsets = [24, 0], sizes = [8, 16], strides = [1, 1]} : vector<32x16xf32> to vector<8x16xf32>
    %263 = vector.extract_strided_slice %203 {offsets = [0, 24], sizes = [16, 8], strides = [1, 1]} : vector<16x32xf32> to vector<16x8xf32>
    %cst_89 = arith.constant dense<0.000000e+00> : vector<16x16xf32>
    %264 = tpu.matmul %261, %262, %cst_89 {dimension_numbers = #tpu.dot_dimension_numbers<[1], [0], [0], [1], [0, 0, 1, 1], [], []>} : vector<16x8xf32>, vector<8x16xf32>, vector<16x16xf32> -> vector<16x16xf32>
    %265 = arith.addf %264, %35 : vector<16x16xf32>
    %cst_90 = arith.constant dense<0xFF800000> : vector<16xf32>
    %266 = vector.multi_reduction <maximumf>, %265, %cst_90 [1] : vector<16x16xf32> to vector<16xf32>
    %267 = vector.shape_cast %266 : vector<16xf32> to vector<16x1xf32>
    %268 = vector.broadcast %267 : vector<16x1xf32> to vector<16x16xf32>
    %269 = arith.subf %265, %268 : vector<16x16xf32>
    %270 = math.exp %269 : vector<16x16xf32>
    %cst_91 = arith.constant dense<0.000000e+00> : vector<16xf32>
    %271 = vector.multi_reduction <add>, %270, %cst_91 [1] : vector<16x16xf32> to vector<16xf32>
    %272 = vector.shape_cast %271 : vector<16xf32> to vector<16x1xf32>
    %cst_92 = arith.constant dense<0.000000e+00> : vector<16x8xf32>
    %273 = tpu.matmul %270, %263, %cst_92 {dimension_numbers = #tpu.dot_dimension_numbers<[1], [0], [0], [1], [0, 0, 1, 1], [], []>} : vector<16x16xf32>, vector<16x8xf32>, vector<16x8xf32> -> vector<16x8xf32>
    %274 = tpu.reciprocal %272 {approx = true} : vector<16x1xf32> -> vector<16x1xf32>
    %275 = vector.broadcast %274 : vector<16x1xf32> to vector<16x8xf32>
    %276 = arith.mulf %273, %275 : vector<16x8xf32>
    %c440 = arith.constant 440 : index
    %c0_93 = arith.constant 0 : index
    %277 = vector.load %arg3[%c440, %c0_93] : memref<608x128xf32, #tpu.memory_space<vmem>>, vector<8x32xf32>
    %cst_94 = arith.constant dense<0.000000e+00> : vector<16x32xf32>
    %278 = tpu.matmul %276, %277, %cst_94 {dimension_numbers = #tpu.dot_dimension_numbers<[1], [0], [0], [1], [0, 0, 1, 1], [], []>} : vector<16x8xf32>, vector<8x32xf32>, vector<16x32xf32> -> vector<16x32xf32>
    %279 = arith.addf %260, %278 : vector<16x32xf32>
    %c28 = arith.constant 28 : index
    %c0_95 = arith.constant 0 : index
    %280 = vector.load %arg2[%c28, %c0_95] : memref<40x128xf32, #tpu.memory_space<vmem>>, vector<1x32xf32>
    %281 = vector.broadcast %280 : vector<1x32xf32> to vector<16x32xf32>
    %282 = arith.addf %279, %281 : vector<16x32xf32>
    %283 = arith.addf %195, %282 : vector<16x32xf32>
    %c29 = arith.constant 29 : index
    %c0_96 = arith.constant 0 : index
    %284 = vector.load %arg2[%c29, %c0_96] : memref<40x128xf32, #tpu.memory_space<vmem>>, vector<1x32xf32>
    %c30 = arith.constant 30 : index
    %c0_97 = arith.constant 0 : index
    %285 = vector.load %arg2[%c30, %c0_97] : memref<40x128xf32, #tpu.memory_space<vmem>>, vector<1x32xf32>
    %cst_98 = arith.constant dense<0.000000e+00> : vector<16xf32>
    %286 = vector.multi_reduction <add>, %283, %cst_98 [1] : vector<16x32xf32> to vector<16xf32>
    %287 = vector.shape_cast %286 : vector<16xf32> to vector<16x1xf32>
    %cst_99 = arith.constant 3.200000e+01 : f32
    %288 = vector.broadcast %cst_99 : f32 to vector<16x1xf32>
    %289 = arith.divf %287, %288 : vector<16x1xf32>
    %290 = arith.mulf %283, %283 : vector<16x32xf32>
    %cst_100 = arith.constant dense<0.000000e+00> : vector<16xf32>
    %291 = vector.multi_reduction <add>, %290, %cst_100 [1] : vector<16x32xf32> to vector<16xf32>
    %292 = vector.shape_cast %291 : vector<16xf32> to vector<16x1xf32>
    %cst_101 = arith.constant 3.200000e+01 : f32
    %293 = vector.broadcast %cst_101 : f32 to vector<16x1xf32>
    %294 = arith.divf %292, %293 : vector<16x1xf32>
    %295 = arith.mulf %289, %289 : vector<16x1xf32>
    %296 = arith.subf %294, %295 : vector<16x1xf32>
    %297 = vector.broadcast %289 : vector<16x1xf32> to vector<16x32xf32>
    %298 = arith.subf %283, %297 : vector<16x32xf32>
    %cst_102 = arith.constant 9.99999996E-13 : f32
    %299 = vector.broadcast %cst_102 : f32 to vector<16x1xf32>
    %300 = arith.addf %296, %299 : vector<16x1xf32>
    %301 = math.rsqrt %300 : vector<16x1xf32>
    %302 = vector.broadcast %301 : vector<16x1xf32> to vector<16x32xf32>
    %303 = arith.mulf %298, %302 : vector<16x32xf32>
    %304 = vector.broadcast %284 : vector<1x32xf32> to vector<16x32xf32>
    %305 = arith.mulf %303, %304 : vector<16x32xf32>
    %306 = vector.broadcast %285 : vector<1x32xf32> to vector<16x32xf32>
    %307 = arith.addf %305, %306 : vector<16x32xf32>
    %c448 = arith.constant 448 : index
    %c0_103 = arith.constant 0 : index
    %308 = vector.load %arg3[%c448, %c0_103] : memref<608x128xf32, #tpu.memory_space<vmem>>, vector<32x128xf32>
    %c31 = arith.constant 31 : index
    %c0_104 = arith.constant 0 : index
    %309 = vector.load %arg2[%c31, %c0_104] : memref<40x128xf32, #tpu.memory_space<vmem>>, vector<1x128xf32>
    %cst_105 = arith.constant dense<0.000000e+00> : vector<16x128xf32>
    %310 = tpu.matmul %307, %308, %cst_105 {dimension_numbers = #tpu.dot_dimension_numbers<[1], [0], [0], [1], [0, 0, 1, 1], [], []>} : vector<16x32xf32>, vector<32x128xf32>, vector<16x128xf32> -> vector<16x128xf32>
    %311 = vector.broadcast %309 : vector<1x128xf32> to vector<16x128xf32>
    %312 = arith.addf %310, %311 : vector<16x128xf32>
    %cst_106 = arith.constant 5.000000e-01 : f32
    %313 = vector.broadcast %cst_106 : f32 to vector<16x128xf32>
    %314 = arith.mulf %313, %312 : vector<16x128xf32>
    %cst_107 = arith.constant 4.471500e-02 : f32
    %315 = vector.broadcast %cst_107 : f32 to vector<16x128xf32>
    %316 = arith.mulf %315, %312 : vector<16x128xf32>
    %317 = arith.mulf %316, %312 : vector<16x128xf32>
    %318 = arith.mulf %317, %312 : vector<16x128xf32>
    %319 = arith.addf %312, %318 : vector<16x128xf32>
    %cst_108 = arith.constant 0.797884583 : f32
    %320 = vector.broadcast %cst_108 : f32 to vector<16x128xf32>
    %321 = arith.mulf %320, %319 : vector<16x128xf32>
    %322 = math.tanh %321 : vector<16x128xf32>
    %cst_109 = arith.constant 1.000000e+00 : f32
    %323 = vector.broadcast %cst_109 : f32 to vector<16x128xf32>
    %324 = arith.addf %323, %322 : vector<16x128xf32>
    %325 = arith.mulf %314, %324 : vector<16x128xf32>
    %c480 = arith.constant 480 : index
    %c0_110 = arith.constant 0 : index
    %326 = vector.load %arg3[%c480, %c0_110] : memref<608x128xf32, #tpu.memory_space<vmem>>, vector<128x32xf32>
    %c32 = arith.constant 32 : index
    %c0_111 = arith.constant 0 : index
    %327 = vector.load %arg2[%c32, %c0_111] : memref<40x128xf32, #tpu.memory_space<vmem>>, vector<1x32xf32>
    %cst_112 = arith.constant dense<0.000000e+00> : vector<16x32xf32>
    %328 = tpu.matmul %325, %326, %cst_112 {dimension_numbers = #tpu.dot_dimension_numbers<[1], [0], [0], [1], [0, 0, 1, 1], [], []>} : vector<16x128xf32>, vector<128x32xf32>, vector<16x32xf32> -> vector<16x32xf32>
    %329 = vector.broadcast %327 : vector<1x32xf32> to vector<16x32xf32>
    %330 = arith.addf %328, %329 : vector<16x32xf32>
    %331 = arith.addf %307, %330 : vector<16x32xf32>
    %c33 = arith.constant 33 : index
    %c0_113 = arith.constant 0 : index
    %332 = vector.load %arg2[%c33, %c0_113] : memref<40x128xf32, #tpu.memory_space<vmem>>, vector<1x32xf32>
    %c34 = arith.constant 34 : index
    %c0_114 = arith.constant 0 : index
    %333 = vector.load %arg2[%c34, %c0_114] : memref<40x128xf32, #tpu.memory_space<vmem>>, vector<1x32xf32>
    %cst_115 = arith.constant dense<0.000000e+00> : vector<16xf32>
    %334 = vector.multi_reduction <add>, %331, %cst_115 [1] : vector<16x32xf32> to vector<16xf32>
    %335 = vector.shape_cast %334 : vector<16xf32> to vector<16x1xf32>
    %cst_116 = arith.constant 3.200000e+01 : f32
    %336 = vector.broadcast %cst_116 : f32 to vector<16x1xf32>
    %337 = arith.divf %335, %336 : vector<16x1xf32>
    %338 = arith.mulf %331, %331 : vector<16x32xf32>
    %cst_117 = arith.constant dense<0.000000e+00> : vector<16xf32>
    %339 = vector.multi_reduction <add>, %338, %cst_117 [1] : vector<16x32xf32> to vector<16xf32>
    %340 = vector.shape_cast %339 : vector<16xf32> to vector<16x1xf32>
    %cst_118 = arith.constant 3.200000e+01 : f32
    %341 = vector.broadcast %cst_118 : f32 to vector<16x1xf32>
    %342 = arith.divf %340, %341 : vector<16x1xf32>
    %343 = arith.mulf %337, %337 : vector<16x1xf32>
    %344 = arith.subf %342, %343 : vector<16x1xf32>
    %345 = vector.broadcast %337 : vector<16x1xf32> to vector<16x32xf32>
    %346 = arith.subf %331, %345 : vector<16x32xf32>
    %cst_119 = arith.constant 9.99999996E-13 : f32
    %347 = vector.broadcast %cst_119 : f32 to vector<16x1xf32>
    %348 = arith.addf %344, %347 : vector<16x1xf32>
    %349 = math.rsqrt %348 : vector<16x1xf32>
    %350 = vector.broadcast %349 : vector<16x1xf32> to vector<16x32xf32>
    %351 = arith.mulf %346, %350 : vector<16x32xf32>
    %352 = vector.broadcast %332 : vector<1x32xf32> to vector<16x32xf32>
    %353 = arith.mulf %351, %352 : vector<16x32xf32>
    %354 = vector.broadcast %333 : vector<1x32xf32> to vector<16x32xf32>
    %355 = arith.addf %353, %354 : vector<16x32xf32>
    %c128 = arith.constant 128 : index
    %c0_120 = arith.constant 0 : index
    %356 = vector.load %arg3[%c128, %c0_120] : memref<608x128xf32, #tpu.memory_space<vmem>>, vector<32x128xf32>
    %c18 = arith.constant 18 : index
    %c0_121 = arith.constant 0 : index
    %357 = vector.load %arg2[%c18, %c0_121] : memref<40x128xf32, #tpu.memory_space<vmem>>, vector<1x128xf32>
    %cst_122 = arith.constant dense<0.000000e+00> : vector<16x128xf32>
    %358 = tpu.matmul %355, %356, %cst_122 {dimension_numbers = #tpu.dot_dimension_numbers<[1], [0], [0], [1], [0, 0, 1, 1], [], []>} : vector<16x32xf32>, vector<32x128xf32>, vector<16x128xf32> -> vector<16x128xf32>
    %359 = vector.broadcast %357 : vector<1x128xf32> to vector<16x128xf32>
    %360 = arith.addf %358, %359 : vector<16x128xf32>
    %c0_123 = arith.constant 0 : index
    %c0_124 = arith.constant 0 : index
    %361 = vector.load %arg4[%c0_123, %c0_124] : memref<16x128xf32, #tpu.memory_space<vmem>>, vector<16x128xf32>
    tpu.vector_store %arg4[%c0_123, %c0_124], %360 {strides = array<i32>} : memref<16x128xf32, #tpu.memory_space<vmem>>, vector<16x128xf32>,
    %cst_125 = arith.constant dense<0xFF800000> : vector<16xf32>
    %362 = vector.multi_reduction <maximumf>, %360, %cst_125 [1] : vector<16x128xf32> to vector<16xf32>
    %363 = vector.shape_cast %362 : vector<16xf32> to vector<16x1xf32>
    %364 = vector.broadcast %363 : vector<16x1xf32> to vector<16x128xf32>
    %365 = arith.subf %360, %364 : vector<16x128xf32>
    %366 = math.exp %365 : vector<16x128xf32>
    %cst_126 = arith.constant dense<0.000000e+00> : vector<16xf32>
    %367 = vector.multi_reduction <add>, %366, %cst_126 [1] : vector<16x128xf32> to vector<16xf32>
    %368 = vector.shape_cast %367 : vector<16xf32> to vector<16x1xf32>
    %369 = math.log %368 : vector<16x1xf32>
    %370 = arith.addf %369, %363 : vector<16x1xf32>
    %371 = tpu.iota {dimensions = array<i32: 1>} : vector<16x128xi32>
    %372 = vector.broadcast %1 : vector<16x1xi32> to vector<16x128xi32>
    %373 = arith.cmpi eq, %371, %372 : vector<16x128xi32>
    %374 = arith.extui %373 : vector<16x128xi1> to vector<16x128xi32>
    %375 = arith.sitofp %374 : vector<16x128xi32> to vector<16x128xf32>
    %376 = arith.mulf %360, %375 : vector<16x128xf32>
    %cst_127 = arith.constant dense<0.000000e+00> : vector<16xf32>
    %377 = vector.multi_reduction <add>, %376, %cst_127 [1] : vector<16x128xf32> to vector<16xf32>
    %378 = vector.shape_cast %377 : vector<16xf32> to vector<16x1xf32>
    %c-100_i32 = arith.constant -100 : i32
    %379 = vector.broadcast %c-100_i32 : i32 to vector<16x1xi32>
    %380 = arith.cmpi ne, %1, %379 : vector<16x1xi32>
    %381 = arith.extui %380 : vector<16x1xi1> to vector<16x1xi32>
    %382 = arith.sitofp %381 : vector<16x1xi32> to vector<16x1xf32>
    %383 = arith.subf %370, %378 : vector<16x1xf32>
    %384 = arith.mulf %383, %382 : vector<16x1xf32>
    %385 = vector.shape_cast %384 : vector<16x1xf32> to vector<1x16x1xf32>
    %cst_128 = arith.constant dense<0.000000e+00> : vector<1xf32>
    %386 = vector.multi_reduction <add>, %385, %cst_128 [1, 2] : vector<1x16x1xf32> to vector<1xf32>
    %387 = vector.shape_cast %386 : vector<1xf32> to vector<1x1x1xf32>
    %388 = vector.extract %387[0, 0, 0] : f32 from vector<1x1x1xf32>
    %389 = vector.broadcast %388 : f32 to vector<1x1xf32>
    %390 = vector.shape_cast %382 : vector<16x1xf32> to vector<1x16x1xf32>
    %cst_129 = arith.constant dense<0.000000e+00> : vector<1xf32>
    %391 = vector.multi_reduction <add>, %390, %cst_129 [1, 2] : vector<1x16x1xf32> to vector<1xf32>
    %392 = vector.shape_cast %391 : vector<1xf32> to vector<1x1x1xf32>
    %393 = vector.extract %392[0, 0, 0] : f32 from vector<1x1x1xf32>
    %394 = vector.broadcast %393 : f32 to vector<1x1xf32>
    %cst_130 = arith.constant 1.000000e+00 : f32
    %395 = vector.broadcast %cst_130 : f32 to vector<1x1xf32>
    %396 = arith.maximumf %394, %395 : vector<1x1xf32>
    %397 = tpu.reciprocal %396 {approx = true} : vector<1x1xf32> -> vector<1x1xf32>
    %398 = arith.mulf %389, %397 : vector<1x1xf32>
    %c0_131 = arith.constant 0 : index
    %c0_132 = arith.constant 0 : index
    %399 = vector.load %arg5[%c0_131, %c0_132] : memref<1x1xf32, #tpu.memory_space<vmem>>, vector<1x1xf32>
    tpu.vector_store %arg5[%c0_131, %c0_132], %398 {strides = array<i32>} : memref<1x1xf32, #tpu.memory_space<vmem>>, vector<1x1xf32>,
    return
  }
}

</mosaic_0001>

<bundles_post_ra>
// kernel: eq.8
= control target key start
LH: loop header
LB: loop body
LE: loop exit
PB: predicated region body
PF: predicated region fallthrough
CT: control target
= control target key end

     0   :  { %vm7_vm0 = vcmask 64512   ;;  %vm13_vm1 = vcmask 130112   ;;  %s39_s0 = inlined_call_operand.vmem [shape: s32[2,8], index: 0, kind: input, shape index: {}]   ;;  %s40_s1 = inlined_call_operand.vmem [shape: s32[16], index: 1, kind: output, shape index: {}]  }
   0x1   :  { %v4_v0 = vld [vmem:[%s39_s0] sm:$0x3]  ;;  %s22_s0 = smov 8  }
   0x2   :  { %5 = vst [vmem:[#allocation1] sm:$0x3] %v4_v0 }
   0x9   :  { %v10_v1 = vld [vmem:[#allocation1 + $0x1] sm:$0x1]   ;;  %v6_v2 = vld [vmem:[#allocation1] sm:$0x1]  }
   0xa   :  { %11 = vrot.lane.b32.xlu0 %v10_v1, %s22_s0  ;;  %8 = vst.msk [vmem:[#allocation0] sm:$0x1] %vm7_vm0, %v6_v2  }
  0x7c   :  { %v12_v3 = vpop.permute.xlu0 %11  }
  0x7d   :  { %14 = vst.msk [vmem:[#allocation0] sm:$0x1] %vm13_vm1, %v12_v3  }
  0x84   :  { %v17_v4 = vld [vmem:[#allocation0] sm:$0x1] }
  0x85   :  { %20 = vst [vmem:[%s40_s1] sm:$0x1] %v17_v4 }

// kernel: forward.1
= control target key start
LH: loop header
LB: loop body
LE: loop exit
PB: predicated region body
PF: predicated region fallthrough
CT: control target
= control target key end

     0   :  { %11 = vsyncpa [#allocation3], 0  ;;  %s2637_s0 = inlined_call_operand.vmem [shape: s32[16,2], index: 0, kind: input, shape index: {}]   ;;  %s2638_s1 = inlined_call_operand.vmem [shape: f32[16,16], index: 1, kind: input, shape index: {}]   ;;  %s2639_s2 = inlined_call_operand.vmem [shape: f32[40,128], index: 2, kind: input, shape index: {}]   ;;  %s2640_s3 = inlined_call_operand.hbm [shape: f32[608,128], index: 3, kind: input, shape index: {}]   ;;  %s2641_s4 = inlined_call_operand.vmem [shape: f32[16,128], index: 4, kind: output, shape index: {0}]   ;;  %s2642_s5 = inlined_call_operand.hbm [shape: f32[1,1], index: 5, kind: output, shape index: {1}]  }
   0x1   :  { %12 = vsyncpa [#allocation4], 0  ;;  %s23_s20 = sshll.u32 %s2640_s3, 4  ;;  %s2159_s21 = smov [#allocation2]   ;;  %s24_s20 = int_to_ptr.hbm [resolvable:$true] %s23_s20 }
   0x2   :  { %s25_s22 = sshll.u32 %s2159_s21, 4  ;;  %s2160_s23 = smov 128   ;;  %s26_s22 = int_to_ptr.vmem [resolvable:$true] %s25_s22 }
   0x3   :  { %s2161_s24 = smov 8  }
   0x4   :  { %31 = dma.hbm_to_vmem [thread:$0]  %s24_s20, 9728, %s26_s22, [#allocation3], %s2160_s23, %s2160_s23, %s2161_s24  }
   0x5   :  { %2155 = dma.done.wait [#allocation3], 9728  }
   0x6   :  { %2156 = vsyncadd [#allocation3], 4294957568  ;;  %v2162_v0 = vmov 0   ;;  %v36_v1 = vld [vmem:[%s2637_s0] sm:$0xff]  ;;  %v67_v2 = vld [vmem:[#allocation2 + $0x78] sm:$0xff]  ;;  %v38_v19 = vlaneseq  ;;  %v2163_v22 = vmov 1.0  }
   0x7   :  { %1932 = vset.pattern.permute.xlu0 %v2162_v0  ;;  %70 = vmatpush.msra.mxu0 %v67_v2  ;;  %v66_v3 = vld [vmem:[#allocation2 + $0x70] sm:$0xff]  ;;  %v65_v4 = vld [vmem:[#allocation2 + $0x68] sm:$0xff]  ;;  %v64_v5 = vld [vmem:[#allocation2 + $0x60] sm:$0xff]  ;;  %vm95_vm2 = vcmask 261120   ;;  %v2164_v36 = vmov 32.0   ;;  %s2165_s13 = smov 96  }
   0x8   :  { %41 = vperm.xlu0 %1932, %v36_v1   ;;  %v37_v6 = vld [vmem:[%s2637_s0 + $0x8] sm:$0xff]  ;;  %v63_v7 = vld [vmem:[#allocation2 + $0x58] sm:$0xff]  ;;  %v62_v8 = vld [vmem:[#allocation2 + $0x50] sm:$0xff]  ;;  %v2219_v20 = vand.u32 127, %v38_v19  ;;  %1999 = vrcp.f32 %v2164_v36  ;;  %s2166_s14 = smov 88   ;;  %s2167_s15 = smov 120  }
   0x9   :  { %71 = vmatpush.msra.mxu0 %v66_v3  ;;  %v61_v9 = vld [vmem:[#allocation2 + $0x48] sm:$0xff]  ;;  %v60_v10 = vld [vmem:[#allocation2 + $0x40] sm:$0xff]  ;;  %v59_v11 = vld [vmem:[#allocation2 + $0x38] sm:$0xff]  ;;  %s2168_s16 = smov 64   ;;  %s2169_s17 = smov 80   ;;  %vm200_vm10 = vcmask 64512  }
   0xa   :  { %v58_v12 = vld [vmem:[#allocation2 + $0x30] sm:$0xff]  ;;  %v57_v13 = vld [vmem:[#allocation2 + $0x28] sm:$0xff]  ;;  %v56_v14 = vld [vmem:[#allocation2 + $0x20] sm:$0xff]  ;;  %s2170_s18 = smov 104   ;;  %vm232_vm11 = vcmask 130048   ;;  %s2171_s23 = smov 56  }
   0xb   :  { %72 = vmatpush.msra.mxu0 %v65_v4  ;;  %v55_v15 = vld [vmem:[#allocation2 + $0x18] sm:$0xff]  ;;  %v54_v16 = vld [vmem:[#allocation2 + $0x10] sm:$0xff]  ;;  %v53_v17 = vld [vmem:[#allocation2 + $0x8] sm:$0xff]  ;;  %s2172_s24 = smov 72   ;;  %s2173_s25 = smov 112  }
   0xc   :  { %v52_v18 = vld [vmem:[#allocation2] sm:$0xff]  ;;  %v69_v28 = vld [vmem:[%s2639_s2 + $0xa] sm:$0xff]  ;;  %v162_v42 = vld [vmem:[#allocation2 + $0xb8] sm:$0xff]  ;;  %s2174_s26 = smov 48   ;;  %s2175_s3 = smov 40  }
   0xd   :  { %73 = vmatpush.msra.mxu0 %v64_v5  ;;  %v68_v24 = vld [vmem:[%s2639_s2 + $0x2] sm:$0xff]  ;;  %183 = vmatpush.msra.mxu1 %v162_v42  ;;  %v161_v44 = vld [vmem:[#allocation2 + $0xb0] sm:$0xff] }
   0xe   :  { %v2000_v37 = vpop.eup %1999  ;;  %v160_v46 = vld [vmem:[#allocation2 + $0xa8] sm:$0xff]  ;;  %v159_v48 = vld [vmem:[#allocation2 + $0xa0] sm:$0xff] }
   0xf   :  { %74 = vmatpush.msra.mxu0 %v63_v7  ;;  %v103_v38 = vmul.f32 32.0, %v2000_v37  ;;  %vm107_vm3 = vweird.f32 %v2000_v37  ;;  %184 = vmatpush.msra.mxu1 %v161_v44 }
  0x10   :  { %44 = vperm.xlu0 %1932, %v37_v6   ;;  %v1980_v6 = vld [vmem:[%s2639_s2] ss:$0 sm:$0xff] }
  0x11   :  { %75 = vmatpush.msra.mxu0 %v62_v8  ;;  %v104_v39 = vsub.f32 1.0, %v103_v38  ;;  %185 = vmatpush.msra.mxu1 %v160_v46 }
  0x13   :  { %76 = vmatpush.msra.mxu0 %v61_v9  ;;  %v105_v40 = vmul.f32 %v2000_v37, %v104_v39  ;;  %186 = vmatpush.msra.mxu1 %v159_v48 }
  0x15   :  { %77 = vmatpush.msra.mxu0 %v60_v10  ;;  %v106_v41 = vadd.f32 %v2000_v37, %v105_v40  ;;  %v1981_v10 = vld [vmem:[%s2639_s2 + $0x1] ss:$0 sm:$0xff] }
  0x17   :  { %78 = vmatpush.msra.mxu0 %v59_v11  ;;  %v2243_v45 = vsel %vm107_vm3, %v2000_v37, %v106_v41  ;;  %v2307_v37 = vld [vmem:[%s2638_s1] sm:$0xff]  ;;  %v2314_v41 = vld [vmem:[%s2638_s1 + $0x8] sm:$0xff] }
  0x19   :  { %79 = vmatpush.msra.mxu0 %v58_v12 }
  0x1b   :  { %80 = vmatpush.msra.mxu0 %v57_v13 }
  0x1d   :  { %81 = vmatpush.msra.mxu0 %v56_v14 }
  0x1f   :  { %82 = vmatpush.msra.mxu0 %v55_v15 }
  0x21   :  { %83 = vmatpush.msra.mxu0 %v54_v16 }
  0x23   :  { %84 = vmatpush.msra.mxu0 %v53_v17 }
  0x25   :  { %85 = vmatpush.msra.mxu0 %v52_v18 }
  0x7a   :  { %v42_v21 = vpop.permute.xlu0 %41 }
  0x7b   :  { %vm46_vm0 = vcmp.eq.s32.totalorder %v2219_v20, %v42_v21 }
  0x7c   :  { %1827 = vmatmul.msk.f32.vlgmr.msra.gmra.mxu0 %vm46_vm0, %v2163_v22 }
  0x82   :  { %v45_v23 = vpop.permute.xlu0 %44 }
  0x83   :  { %vm47_vm1 = vcmp.eq.s32.totalorder %v2219_v20, %v45_v23 }
  0x84   :  { %1828 = vmatmul.msk.f32.gmra.mxu0 %vm47_vm1, %v2163_v22  ;;  %v1982_v22 = vld [vmem:[%s2639_s2 + $0x13] ss:$0 sm:$0xff] }
  0xf9   :  { %v87_v25 = vpop.f32.mrf.mxu0 }
  0xfa   :  { %v2226_v26 = vadd.f32 %v87_v25, %v68_v24 }
  0xfc   :  { %v96_v27 = vsel %vm95_vm2, %v2226_v26, 0.0  ;;  %v111_v29 = vmul.f32 %v2226_v26, %v2226_v26 }
  0xfd   :  { %97 = vadd.xlane.f32.xlu1 %v96_v27 }
  0xfe   :  { %v113_v32 = vsel %vm95_vm2, %v111_v29, 0.0 }
 0x101   :  { %v90_v30 = vpop.f32.mrf.mxu0 }
 0x102   :  { %v2235_v31 = vadd.f32 %v90_v30, %v69_v28 }
 0x104   :  { %v99_v33 = vsel %vm95_vm2, %v2235_v31, 0.0  ;;  %v112_v34 = vmul.f32 %v2235_v31, %v2235_v31 }
 0x105   :  { %114 = vadd.xlane.f32.xlu1 %v113_v32  ;;  %100 = vadd.xlane.f32.xlu2 %v99_v33 }
 0x106   :  { %v116_v35 = vsel %vm95_vm2, %v112_v34, 0.0 }
 0x10d   :  { %117 = vadd.xlane.f32.xlu2 %v116_v35 }
 0x170   :  { %v98_v43 = vpop.xlane.xlu1 %97 }
 0x171   :  { %v109_v47 = vmul.f32 %v2243_v45, %v98_v43 }
 0x173   :  { %v121_v51 = vmul.f32 %v109_v47, %v109_v47  ;;  %v125_v5 = vsub.f32 %v2226_v26, %v109_v47 }
 0x178   :  { %v115_v49 = vpop.xlane.xlu1 %114  ;;  %v101_v50 = vpop.xlane.xlu2 %100 }
 0x179   :  { %v119_v52 = vmul.f32 %v115_v49, %v2243_v45  ;;  %v110_v55 = vmul.f32 %v2243_v45, %v101_v50 }
 0x17b   :  { %v123_v53 = vsub.f32 %v119_v52, %v121_v51  ;;  %v122_v57 = vmul.f32 %v110_v55, %v110_v55  ;;  %v126_v16 = vsub.f32 %v2235_v31, %v110_v55  ;;  %v290_v52 = vld [vmem:[#allocation2 + $0xc0] sm:$0xff] }
 0x17d   :  { %v127_v54 = vadd.f32 1e-12, %v123_v53 }
 0x17f   :  { %2001 = vrsqrt.f32 %v127_v54  ;;  %vm135_vm5 = vweird.f32 %v127_v54 }
 0x180   :  { %v118_v56 = vpop.xlane.xlu2 %117 }
 0x181   :  { %v120_v58 = vmul.f32 %v118_v56, %v2243_v45 }
 0x183   :  { %v124_v59 = vsub.f32 %v120_v58, %v122_v57 }
 0x185   :  { %v2002_v60 = vpop.eup %2001  ;;  %v128_v61 = vadd.f32 1e-12, %v124_v59 }
 0x186   :  { %v130_v62 = vmul.f32 %v2002_v60, %v127_v54  ;;  %vm136_vm4 = vweird.f32 %v2002_v60 }
 0x187   :  { %2003 = vrsqrt.f32 %v128_v61  ;;  %vm137_vm6 = vmor %vm135_vm5, %vm136_vm4  ;;  %vm145_vm8 = vweird.f32 %v128_v61 }
 0x188   :  { %v131_v63 = vmul.f32 %v2002_v60, %v130_v62 }
 0x18a   :  { %v132_v0 = vmul.f32 0.5, %v131_v63 }
 0x18c   :  { %v133_v1 = vsub.f32 1.5, %v132_v0 }
 0x18d   :  { %v2004_v2 = vpop.eup %2003 }
 0x18e   :  { %v134_v3 = vmul.f32 %v2002_v60, %v133_v1  ;;  %v140_v4 = vmul.f32 %v2004_v2, %v128_v61  ;;  %vm146_vm7 = vweird.f32 %v2004_v2 }
 0x18f   :  { %vm147_vm9 = vmor %vm145_vm8, %vm146_vm7 }
 0x190   :  { %v141_v7 = vmul.f32 %v2004_v2, %v140_v4  ;;  %v138_v8 = vsel %vm137_vm6, %v2002_v60, %v134_v3 }
 0x191   :  { %v149_v9 = vmul.f32 %v138_v8, %v125_v5 }
 0x192   :  { %v142_v11 = vmul.f32 0.5, %v141_v7 }
 0x193   :  { %v152_v12 = vmul.f32 %v1980_v6, %v149_v9 }
 0x194   :  { %v143_v13 = vsub.f32 1.5, %v142_v11 }
 0x195   :  { %v2256_v14 = vadd.f32 %v1981_v10, %v152_v12 }
 0x196   :  { %v144_v15 = vmul.f32 %v2004_v2, %v143_v13 }
 0x197   :  { %1829 = vmatmul.msk.f32.vlgmr.msra.gmra.mxu1 %vm95_vm2, %v2256_v14 }
 0x198   :  { %v148_v17 = vsel %vm147_vm9, %v2004_v2, %v144_v15 }
 0x199   :  { %v150_v18 = vmul.f32 %v148_v17, %v126_v16 }
 0x19b   :  { %v153_v19 = vmul.f32 %v1980_v6, %v150_v18 }
 0x19d   :  { %v2261_v21 = vadd.f32 %v1981_v10, %v153_v19 }
 0x19f   :  { %1830 = vmatmul.msk.f32.gmra.mxu1 %vm95_vm2, %v2261_v21 }
 0x214   :  { %v188_v23 = vpop.f32.mrf.mxu1 }
 0x215   :  { %v2268_v24 = vadd.f32 %v1982_v22, %v188_v23 }
 0x217   :  { %196 = vrot.lane.b32.xlu1 %v2268_v24, %s2165_s13 }
 0x21c   :  { %v191_v25 = vpop.f32.mrf.mxu1 }
 0x21d   :  { %v2272_v26 = vadd.f32 %v1982_v22, %v191_v25 }
 0x21f   :  { %297 = vrot.lane.b32.xlu2 %v2272_v26, %s2166_s14  ;;  %198 = vrot.lane.b32.xlu0 %v2272_v26, %s2165_s13  ;;  %v2286_v27 = vpack.i.bf16 %v2268_v24, %v2272_v26 }
 0x227   :  { %295 = vrot.lane.b32.xlu0 %v2268_v24, %s2166_s14 }
 0x22f   :  { %291 = vrot.lane.b32.xlu0 %v2268_v24, %s2167_s15 }
 0x237   :  { %293 = vrot.lane.b32.xlu0 %v2272_v26, %s2167_s15 }
 0x23f   :  { %1934 = vrot.lane.b32.xlu0 %v2286_v27, %s2168_s16 }
 0x247   :  { %452 = vrot.lane.b32.xlu0 %v2272_v26, %s2169_s17 }
 0x24f   :  { %574 = vrot.lane.b32.xlu0 %v2268_v24, %s2170_s18 }
 0x279   :  { %v298_v28 = vpop.permute.xlu2 %297 }
 0x27a   :  { %1837 = vmatpush.xpose.msk.msra.mxu3 %vm200_vm10, %v298_v28 }
 0x289   :  { %v197_v30 = vpop.permute.xlu1 %196 }
 0x291   :  { %v199_v29 = vpop.permute.xlu0 %198 }
 0x292   :  { %1831 = vmatpush.xpose.msk.msra.mxu2 %vm200_vm10, %v199_v29 }
 0x296   :  { %1832 = vmatpush.xpose.msk.msra.mxu2 %vm200_vm10, %v197_v30 }
 0x299   :  { %1833 = vmatmul.msk.f32.vlgmr.msra.gmra.mxu2 %vm200_vm10, %v2268_v24  ;;  %v296_v31 = vpop.permute.xlu0 %295 }
 0x29a   :  { %1838 = vmatpush.xpose.msk.msra.mxu3 %vm200_vm10, %v296_v31 }
 0x29e   :  { %438 = vmatpush.msrb.mxu3 %v290_v52 }
 0x2a1   :  { %1834 = vmatmul.msk.f32.gmra.mxu2 %vm200_vm10, %v2272_v26  ;;  %v292_v32 = vpop.permute.xlu0 %291 }
 0x2a2   :  { %1839 = vmatmul.msk.f32.vlgmr.msra.gmra.mxu3 %vm200_vm10, %v292_v32  ;;  %v387_v32 = vld [vmem:[#allocation2 + $0xc8] sm:$0xff] }
 0x2a9   :  { %v294_v33 = vpop.permute.xlu0 %293 }
 0x2aa   :  { %1840 = vmatmul.msk.f32.gmra.mxu3 %vm200_vm10, %v294_v33 }
 0x2b1   :  { %v1935_v34 = vpop.permute.xlu0 %1934 }
 0x2b2   :  { %v1936_v35 = vunpack.i.l.bf16 %v1935_v34  ;;  %v1937_v36 = vunpack.i.h.bf16 %v1935_v34 }
 0x2b4   :  { %277 = vmatpush.msrb.mxu2 %v1936_v35 }
 0x2b6   :  { %278 = vmatpush.msrb.mxu2 %v1937_v36 }
 0x2b8   :  { %409 = vmatpush.msra.mxu2 %v387_v32 }
 0x2b9   :  { %v453_v7 = vpop.permute.xlu0 %452 }
 0x2c1   :  { %v575_v17 = vpop.permute.xlu0 %574 }
 0x31c   :  { %v226_v38 = vpop.f32.mrf.mxu2 }
 0x31d   :  { %v227_v39 = vadd.f32 %v226_v38, %v2307_v37 }
 0x31f   :  { %v233_v40 = vsel %vm232_vm11, %v227_v39, -inf }
 0x320   :  { %234 = vmax.xlane.f32.xlu2 %v233_v40 }
 0x324   :  { %v229_v42 = vpop.f32.mrf.mxu2 }
 0x325   :  { %v230_v43 = vadd.f32 %v229_v42, %v2314_v41  ;;  %v324_v44 = vpop.f32.mrf.mxu3 }
 0x326   :  { %v325_v46 = vadd.f32 %v324_v44, %v2307_v37 }
 0x327   :  { %v236_v47 = vsel %vm232_vm11, %v230_v43, -inf }
 0x328   :  { %237 = vmax.xlane.f32.xlu1 %v236_v47  ;;  %v330_v48 = vsel %vm232_vm11, %v325_v46, -inf }
 0x329   :  { %331 = vmax.xlane.f32.xlu2 %v330_v48 }
 0x32d   :  { %v327_v49 = vpop.f32.mrf.mxu3 }
 0x32e   :  { %v328_v50 = vadd.f32 %v327_v49, %v2314_v41 }
 0x330   :  { %v333_v51 = vsel %vm232_vm11, %v328_v50, -inf }
 0x341   :  { %1939 = vrot.lane.b32.xlu1 %v2286_v27, %s2171_s23  ;;  %580 = vrot.lane.b32.xlu2 %v2272_v26, %s2172_s24 }
 0x349   :  { %578 = vrot.lane.b32.xlu1 %v2268_v24, %s2172_s24  ;;  %450 = vrot.lane.b32.xlu2 %v2268_v24, %s2169_s17 }
 0x372   :  { %334 = vmax.xlane.f32.xlu2 %v333_v51 }
 0x38a   :  { %448 = vrot.lane.b32.xlu2 %v2272_v26, %s2173_s25 }
 0x393   :  { %v235_v53 = vpop.xlane.xlu2 %234 }
 0x394   :  { %v239_v54 = vsub.f32 %v227_v39, %v235_v53 }
 0x396   :  { %v241_v55 = vmul.f32 1.442695, %v239_v54 }
 0x398   :  { %2005 = vpow2.f32 %v241_v55 }
 0x39b   :  { %v238_v56 = vpop.xlane.xlu1 %237 }
 0x39c   :  { %v240_v57 = vsub.f32 %v230_v43, %v238_v56  ;;  %v332_v58 = vpop.xlane.xlu2 %331 }
 0x39d   :  { %v336_v1 = vsub.f32 %v325_v46, %v332_v58 }
 0x39e   :  { %v2006_v59 = vpop.eup %2005  ;;  %v243_v60 = vmul.f32 1.442695, %v240_v57 }
 0x39f   :  { %1835 = vmatmul.msk.f32.vlgmr.msrb.gmra.mxu2 %vm232_vm11, %v2006_v59  ;;  %v245_v61 = vsel %vm232_vm11, %v2006_v59, 0.0  ;;  %v338_v2 = vmul.f32 1.442695, %v336_v1 }
 0x3a0   :  { %2007 = vpow2.f32 %v243_v60  ;;  %246 = vadd.xlane.f32.xlu0 %v245_v61 }
 0x3a1   :  { %2009 = vpow2.f32 %v338_v2 }
 0x3a4   :  { %v581_v62 = vpop.permute.xlu2 %580 }
 0x3a5   :  { %1855 = vmatpush.xpose.msk.msra.mxu3 %vm200_vm10, %v581_v62 }
 0x3a6   :  { %v2008_v63 = vpop.eup %2007 }
 0x3a7   :  { %1836 = vmatmul.msk.f32.gmra.mxu2 %vm232_vm11, %v2008_v63  ;;  %v248_v0 = vsel %vm232_vm11, %v2008_v63, 0.0  ;;  %v2010_v6 = vpop.eup %2009 }
 0x3a8   :  { %249 = vadd.xlane.f32.xlu1 %v248_v0  ;;  %v342_v13 = vsel %vm232_vm11, %v2010_v6, 0.0 }
 0x3ac   :  { %v451_v9 = vpop.permute.xlu2 %450 }
 0x3b3   :  { %v1940_v3 = vpop.permute.xlu1 %1939 }
 0x3b4   :  { %576 = vrot.lane.b32.xlu0 %v2272_v26, %s2170_s18  ;;  %v1941_v4 = vunpack.i.l.bf16 %v1940_v3  ;;  %v1942_v5 = vunpack.i.h.bf16 %v1940_v3 }
 0x3b6   :  { %374 = vmatpush.msrb.mxu1 %v1941_v4 }
 0x3b8   :  { %375 = vmatpush.msrb.mxu1 %v1942_v5 }
 0x3b9   :  { %1841 = vmatmul.msk.f32.vlgmr.msrb.gmra.mxu1 %vm232_vm11, %v2010_v6 }
 0x3ba   :  { %1847 = vmatpush.xpose.msk.msra.mxu1 %vm200_vm10, %v453_v7 }
 0x3bb   :  { %v579_v8 = vpop.permute.xlu1 %578 }
 0x3bc   :  { %1856 = vmatpush.xpose.msk.msra.mxu3 %vm200_vm10, %v579_v8 }
 0x3be   :  { %1848 = vmatpush.xpose.msk.msra.mxu1 %vm200_vm10, %v451_v9 }
 0x3c1   :  { %446 = vrot.lane.b32.xlu1 %v2268_v24, %s2173_s25 }
 0x3e5   :  { %v335_v10 = vpop.xlane.xlu2 %334 }
 0x3e6   :  { %v337_v11 = vsub.f32 %v328_v50, %v335_v10 }
 0x3e8   :  { %v340_v12 = vmul.f32 1.442695, %v337_v11 }
 0x3ea   :  { %2011 = vpow2.f32 %v340_v12 }
 0x3eb   :  { %343 = vadd.xlane.f32.xlu1 %v342_v13 }
 0x3ed   :  { %v449_v30 = vpop.permute.xlu2 %448 }
 0x3f0   :  { %v2012_v15 = vpop.eup %2011 }
 0x3f1   :  { %1842 = vmatmul.msk.f32.gmra.mxu1 %vm232_vm11, %v2012_v15  ;;  %v345_v16 = vsel %vm232_vm11, %v2012_v15, 0.0 }
 0x3f2   :  { %346 = vadd.xlane.f32.xlu0 %v345_v16 }
 0x413   :  { %v247_v18 = vpop.xlane.xlu0 %246 }
 0x414   :  { %2013 = vrcp.f32 %v247_v18 }
 0x41a   :  { %v2014_v22 = vpop.eup %2013 }
 0x41b   :  { %v250_v19 = vpop.xlane.xlu1 %249 }
 0x41c   :  { %2015 = vrcp.f32 %v250_v19 }
 0x422   :  { %v280_v23 = vpop.f32.mrf.mxu2  ;;  %v2016_v25 = vpop.eup %2015 }
 0x423   :  { %v288_v24 = vmul.f32 %v2014_v22, %v280_v23 }
 0x425   :  { %1845 = vmatmul.msk.f32.vlgmr.msrb.gmra.mxu3 %vm200_vm10, %v288_v24  ;;  %v542_v24 = vld [vmem:[#allocation2 + $0xd0] sm:$0xff] }
 0x426   :  { %v577_v31 = vpop.permute.xlu0 %576  ;;  %564 = vmatpush.msrb.mxu0 %v542_v24  ;;  %v830_v24 = vld [vmem:[#allocation2 + $0x168] sm:$0xff] }
 0x42a   :  { %v283_v26 = vpop.f32.mrf.mxu2 }
 0x42b   :  { %v289_v28 = vmul.f32 %v2016_v25, %v283_v26  ;;  %v670_v25 = vld [vmem:[#allocation2 + $0xd8] sm:$0xff] }
 0x42d   :  { %1846 = vmatmul.msk.f32.gmra.mxu3 %vm200_vm10, %v289_v28 }
 0x433   :  { %v447_v29 = vpop.permute.xlu1 %446 }
 0x434   :  { %1849 = vmatmul.msk.f32.vlgmr.msra.gmra.mxu1 %vm200_vm10, %v447_v29 }
 0x435   :  { %1857 = vmatmul.msk.f32.vlgmr.msra.gmra.mxu3 %vm200_vm10, %v575_v17 }
 0x436   :  { %v377_v35 = vpop.f32.mrf.mxu1 }
 0x43c   :  { %1850 = vmatmul.msk.f32.gmra.mxu1 %vm200_vm10, %v449_v30 }
 0x43d   :  { %1858 = vmatmul.msk.f32.gmra.mxu3 %vm200_vm10, %v577_v31 }
 0x45e   :  { %v344_v33 = vpop.xlane.xlu1 %343 }
 0x45f   :  { %2017 = vrcp.f32 %v344_v33 }
 0x465   :  { %v2018_v34 = vpop.eup %2017  ;;  %v347_v36 = vpop.xlane.xlu0 %346 }
 0x466   :  { %v385_v38 = vmul.f32 %v2018_v34, %v377_v35  ;;  %2019 = vrcp.f32 %v347_v36 }
 0x468   :  { %1843 = vmatmul.msk.f32.vlgmr.msra.gmra.mxu2 %vm200_vm10, %v385_v38 }
 0x46c   :  { %v2020_v39 = vpop.eup %2019 }
 0x46e   :  { %v380_v40 = vpop.f32.mrf.mxu1 }
 0x46f   :  { %v386_v42 = vmul.f32 %v2020_v39, %v380_v40 }
 0x471   :  { %1844 = vmatmul.msk.f32.gmra.mxu2 %vm200_vm10, %v386_v42 }
 0x4a8   :  { %v440_v43 = vpop.f32.mrf.mxu3 }
 0x4b0   :  { %v2356_v44 = vpop.f32.mrf.mxu3 }
 0x4b1   :  { %v479_v46 = vpop.f32.mrf.mxu1 }
 0x4b2   :  { %v480_v47 = vadd.f32 %v479_v46, %v2307_v37 }
 0x4b4   :  { %v485_v48 = vsel %vm232_vm11, %v480_v47, -inf }
 0x4b5   :  { %486 = vmax.xlane.f32.xlu2 %v485_v48 }
 0x4b8   :  { %v607_v49 = vpop.f32.mrf.mxu3 }
 0x4b9   :  { %v608_v50 = vadd.f32 %v607_v49, %v2307_v37  ;;  %v482_v51 = vpop.f32.mrf.mxu1 }
 0x4ba   :  { %v483_v52 = vadd.f32 %v482_v51, %v2314_v41 }
 0x4bb   :  { %v613_v53 = vsel %vm232_vm11, %v608_v50, -inf }
 0x4bc   :  { %614 = vmax.xlane.f32.xlu1 %v613_v53  ;;  %v488_v54 = vsel %vm232_vm11, %v483_v52, -inf }
 0x4bd   :  { %489 = vmax.xlane.f32.xlu0 %v488_v54 }
 0x4c0   :  { %v610_v55 = vpop.f32.mrf.mxu3 }
 0x4c1   :  { %v611_v56 = vadd.f32 %v610_v55, %v2314_v41 }
 0x4c3   :  { %v616_v57 = vsel %vm232_vm11, %v611_v56, -inf }
 0x4c4   :  { %617 = vmax.xlane.f32.xlu1 %v616_v57 }
 0x4cd   :  { %1944 = vrot.lane.b32.xlu2 %v2286_v27, %s2174_s26 }
 0x4d1   :  { %1949 = vrot.lane.b32.xlu0 %v2286_v27, %s2175_s3 }
 0x4eb   :  { %v411_v58 = vpop.f32.mrf.mxu2 }
 0x4ec   :  { %v2370_v59 = vadd.f32 %v440_v43, %v411_v58 }
 0x4f4   :  { %v414_v28 = vpop.f32.mrf.mxu2 }
 0x528   :  { %v487_v60 = vpop.xlane.xlu2 %486 }
 0x529   :  { %v491_v61 = vsub.f32 %v480_v47, %v487_v60 }
 0x52b   :  { %v493_v62 = vmul.f32 1.442695, %v491_v61 }
 0x52d   :  { %2021 = vpow2.f32 %v493_v62 }
 0x52f   :  { %v615_v63 = vpop.xlane.xlu1 %614 }
 0x530   :  { %v619_v0 = vsub.f32 %v608_v50, %v615_v63  ;;  %v1945_v1 = vpop.permute.xlu2 %1944  ;;  %v490_v2 = vpop.xlane.xlu0 %489  ;;  %v1983_v50 = vld [vmem:[%s2639_s2 + $0x14] ss:$0 sm:$0xff] }
 0x531   :  { %v1946_v3 = vunpack.i.l.bf16 %v1945_v1  ;;  %v492_v4 = vsub.f32 %v483_v52, %v490_v2  ;;  %v1947_v6 = vunpack.i.h.bf16 %v1945_v1 }
 0x532   :  { %v621_v5 = vmul.f32 1.442695, %v619_v0 }
 0x533   :  { %v495_v7 = vmul.f32 1.442695, %v492_v4  ;;  %529 = vmatpush.msrb.mxu2 %v1946_v3  ;;  %v2022_v8 = vpop.eup %2021  ;;  %v767_v3 = vld [vmem:[#allocation2 + $0xf8] sm:$0xff]  ;;  %v766_v4 = vld [vmem:[#allocation2 + $0xf0] sm:$0xff] }
 0x534   :  { %2023 = vpow2.f32 %v621_v5  ;;  %v497_v18 = vsel %vm232_vm11, %v2022_v8, 0.0  ;;  %788 = vmatpush.msra.mxu0 %v767_v3  ;;  %v765_v5 = vld [vmem:[#allocation2 + $0xe8] sm:$0xff] }
 0x535   :  { %2025 = vpow2.f32 %v495_v7  ;;  %530 = vmatpush.msrb.mxu2 %v1947_v6 }
 0x536   :  { %1851 = vmatmul.msk.f32.vlgmr.msrb.gmra.mxu2 %vm232_vm11, %v2022_v8  ;;  %789 = vmatpush.msra.mxu0 %v766_v4 }
 0x537   :  { %v618_v27 = vpop.xlane.xlu1 %617  ;;  %692 = vmatpush.msra.mxu2 %v670_v25 }
 0x538   :  { %v620_v9 = vsub.f32 %v611_v56, %v618_v27  ;;  %v444_v56 = vadd.f32 %v2356_v44, %v414_v28  ;;  %790 = vmatpush.msra.mxu0 %v765_v5  ;;  %v829_v28 = vld [vmem:[#allocation2 + $0x160] sm:$0xff] }
 0x53a   :  { %v2024_v10 = vpop.eup %2023  ;;  %v623_v11 = vmul.f32 1.442695, %v620_v9 }
 0x53b   :  { %v2026_v12 = vpop.eup %2025  ;;  %v625_v13 = vsel %vm232_vm11, %v2024_v10, 0.0 }
 0x53c   :  { %2027 = vpow2.f32 %v623_v11  ;;  %626 = vadd.xlane.f32.xlu1 %v625_v13  ;;  %v500_v15 = vsel %vm232_vm11, %v2026_v12, 0.0 }
 0x53d   :  { %501 = vadd.xlane.f32.xlu0 %v500_v15 }
 0x53e   :  { %1852 = vmatmul.msk.f32.gmra.mxu2 %vm232_vm11, %v2026_v12 }
 0x542   :  { %v2028_v16 = vpop.eup %2027 }
 0x543   :  { %v1950_v17 = vpop.permute.xlu0 %1949  ;;  %v628_v19 = vsel %vm232_vm11, %v2028_v16, 0.0 }
 0x544   :  { %v1951_v22 = vunpack.i.l.bf16 %v1950_v17  ;;  %498 = vadd.xlane.f32.xlu1 %v497_v18  ;;  %629 = vadd.xlane.f32.xlu2 %v628_v19  ;;  %v1952_v23 = vunpack.i.h.bf16 %v1950_v17  ;;  %v831_v17 = vld [vmem:[#allocation2 + $0x170] sm:$0xff] }
 0x546   :  { %657 = vmatpush.msrb.mxu1 %v1951_v22 }
 0x548   :  { %658 = vmatpush.msrb.mxu1 %v1952_v23 }
 0x549   :  { %1859 = vmatmul.msk.f32.vlgmr.msrb.gmra.mxu1 %vm232_vm11, %v2024_v10 }
 0x551   :  { %1860 = vmatmul.msk.f32.gmra.mxu1 %vm232_vm11, %v2028_v16  ;;  %v832_v16 = vld [vmem:[#allocation2 + $0x178] sm:$0xff] }
 0x552   :  { %835 = vmatpush.msrb.mxu3 %v832_v16 }
 0x554   :  { %836 = vmatpush.msrb.mxu3 %v831_v17 }
 0x556   :  { %837 = vmatpush.msrb.mxu3 %v830_v24  ;;  %v1987_v24 = vld [vmem:[%s2639_s2 + $0x18] ss:$0 sm:$0xff] }
 0x558   :  { %838 = vmatpush.msrb.mxu3 %v829_v28 }
 0x5af   :  { %v627_v26 = vpop.xlane.xlu1 %626 }
 0x5b0   :  { %v502_v31 = vpop.xlane.xlu0 %501 }
 0x5b7   :  { %v499_v29 = vpop.xlane.xlu1 %498  ;;  %v630_v34 = vpop.xlane.xlu2 %629 }
 0x5b8   :  { %2029 = vrcp.f32 %v499_v29 }
 0x5b9   :  { %v532_v30 = vpop.f32.mrf.mxu2  ;;  %2031 = vrcp.f32 %v627_v26 }
 0x5ba   :  { %2033 = vrcp.f32 %v502_v31 }
 0x5bb   :  { %2035 = vrcp.f32 %v630_v34 }
 0x5be   :  { %v2030_v32 = vpop.eup %2029 }
 0x5bf   :  { %v540_v33 = vmul.f32 %v2030_v32, %v532_v30  ;;  %v2032_v36 = vpop.eup %2031 }
 0x5c0   :  { %v2034_v39 = vpop.eup %2033 }
 0x5c1   :  { %1853 = vmatmul.msk.f32.vlgmr.msrb.gmra.mxu0 %vm200_vm10, %v540_v33  ;;  %v535_v35 = vpop.f32.mrf.mxu2  ;;  %v2036_v43 = vpop.eup %2035  ;;  %v1984_v33 = vld [vmem:[%s2639_s2 + $0x15] ss:$0 sm:$0xff] }
 0x5c2   :  { %v541_v42 = vmul.f32 %v2034_v39, %v535_v35 }
 0x5c6   :  { %v660_v38 = vpop.f32.mrf.mxu1 }
 0x5c7   :  { %v668_v40 = vmul.f32 %v2032_v36, %v660_v38  ;;  %v1985_v36 = vld [vmem:[%s2639_s2 + $0x16] ss:$0 sm:$0xff] }
 0x5c9   :  { %1861 = vmatmul.msk.f32.vlgmr.msra.gmra.mxu2 %vm200_vm10, %v668_v40  ;;  %1854 = vmatmul.msk.f32.gmra.mxu0 %vm200_vm10, %v541_v42 }
 0x5ce   :  { %v663_v46 = vpop.f32.mrf.mxu1 }
 0x5cf   :  { %v669_v47 = vmul.f32 %v2036_v43, %v663_v46 }
 0x5d1   :  { %1862 = vmatmul.msk.f32.gmra.mxu2 %vm200_vm10, %v669_v47 }
 0x63e   :  { %v566_v48 = vpop.f32.mrf.mxu0 }
 0x63f   :  { %v572_v49 = vadd.f32 %v566_v48, %v2370_v59 }
 0x646   :  { %v569_v55 = vpop.f32.mrf.mxu0 }
 0x647   :  { %v573_v60 = vadd.f32 %v569_v55, %v444_v56  ;;  %v827_v55 = vld [vmem:[#allocation2 + $0x150] sm:$0xff]  ;;  %v826_v56 = vld [vmem:[#allocation2 + $0x148] sm:$0xff] }
 0x64c   :  { %v694_v51 = vpop.f32.mrf.mxu2 }
 0x64d   :  { %v700_v52 = vadd.f32 %v694_v51, %v572_v49 }
 0x64f   :  { %v704_v53 = vadd.f32 %v1983_v50, %v700_v52 }
 0x651   :  { %v2389_v54 = vadd.f32 %v704_v53, %v2256_v14 }
 0x653   :  { %v710_v57 = vsel %vm95_vm2, %v2389_v54, 0.0  ;;  %v718_v61 = vmul.f32 %v2389_v54, %v2389_v54 }
 0x654   :  { %v697_v58 = vpop.f32.mrf.mxu2  ;;  %711 = vadd.xlane.f32.xlu1 %v710_v57  ;;  %v825_v57 = vld [vmem:[#allocation2 + $0x140] sm:$0xff] }
 0x655   :  { %v701_v59 = vadd.f32 %v697_v58, %v573_v60  ;;  %v720_v63 = vsel %vm95_vm2, %v718_v61, 0.0  ;;  %v824_v58 = vld [vmem:[#allocation2 + $0x138] sm:$0xff]  ;;  %v823_v60 = vld [vmem:[#allocation2 + $0x130] sm:$0xff]  ;;  %v821_v61 = vld [vmem:[#allocation2 + $0x120] sm:$0xff] }
 0x657   :  { %v705_v62 = vadd.f32 %v1983_v50, %v701_v59  ;;  %v822_v59 = vld [vmem:[#allocation2 + $0x128] sm:$0xff] }
 0x659   :  { %v2398_v14 = vadd.f32 %v705_v62, %v2261_v21  ;;  %v764_v21 = vld [vmem:[#allocation2 + $0xe0] sm:$0xff]  ;;  %v820_v62 = vld [vmem:[#allocation2 + $0x118] sm:$0xff] }
 0x65a   :  { %791 = vmatpush.msra.mxu0 %v764_v21 }
 0x65b   :  { %v713_v44 = vsel %vm95_vm2, %v2398_v14, 0.0  ;;  %v719_v0 = vmul.f32 %v2398_v14, %v2398_v14 }
 0x65c   :  { %721 = vadd.xlane.f32.xlu1 %v720_v63  ;;  %v819_v63 = vld [vmem:[#allocation2 + $0x110] sm:$0xff] }
 0x65d   :  { %v723_v1 = vsel %vm95_vm2, %v719_v0, 0.0  ;;  %v1986_v0 = vld [vmem:[%s2639_s2 + $0x17] ss:$0 sm:$0xff] }
 0x664   :  { %714 = vadd.xlane.f32.xlu1 %v713_v44  ;;  %v817_v44 = vld [vmem:[#allocation2 + $0x100] sm:$0xff] }
 0x66c   :  { %724 = vadd.xlane.f32.xlu1 %v723_v1 }
 0x6c7   :  { %v712_v2 = vpop.xlane.xlu1 %711 }
 0x6c8   :  { %v716_v6 = vmul.f32 %v712_v2, %v2243_v45 }
 0x6ca   :  { %v728_v8 = vmul.f32 %v716_v6, %v716_v6  ;;  %v732_v32 = vsub.f32 %v2389_v54, %v716_v6  ;;  %v828_v54 = vld [vmem:[#allocation2 + $0x158] sm:$0xff] }
 0x6cb   :  { %839 = vmatpush.msrb.mxu3 %v828_v54 }
 0x6cd   :  { %840 = vmatpush.msrb.mxu3 %v827_v55 }
 0x6cf   :  { %v722_v7 = vpop.xlane.xlu1 %721  ;;  %841 = vmatpush.msrb.mxu3 %v826_v56 }
 0x6d0   :  { %v726_v27 = vmul.f32 %v722_v7, %v2243_v45 }
 0x6d1   :  { %842 = vmatpush.msrb.mxu3 %v825_v57 }
 0x6d2   :  { %v730_v9 = vsub.f32 %v726_v27, %v728_v8 }
 0x6d3   :  { %843 = vmatpush.msrb.mxu3 %v824_v58 }
 0x6d4   :  { %v734_v10 = vadd.f32 1e-12, %v730_v9 }
 0x6d5   :  { %844 = vmatpush.msrb.mxu3 %v823_v60 }
 0x6d6   :  { %2037 = vrsqrt.f32 %v734_v10  ;;  %vm742_vm13 = vweird.f32 %v734_v10 }
 0x6d7   :  { %v715_v11 = vpop.xlane.xlu1 %714  ;;  %845 = vmatpush.msrb.mxu3 %v822_v59 }
 0x6d8   :  { %v717_v13 = vmul.f32 %v715_v11, %v2243_v45 }
 0x6d9   :  { %846 = vmatpush.msrb.mxu3 %v821_v61 }
 0x6da   :  { %v729_v22 = vmul.f32 %v717_v13, %v717_v13  ;;  %v733_v49 = vsub.f32 %v2398_v14, %v717_v13  ;;  %v818_v14 = vld [vmem:[#allocation2 + $0x108] sm:$0xff] }
 0x6db   :  { %847 = vmatpush.msrb.mxu3 %v820_v62 }
 0x6dc   :  { %v2038_v12 = vpop.eup %2037 }
 0x6dd   :  { %v737_v15 = vmul.f32 %v2038_v12, %v734_v10  ;;  %vm743_vm12 = vweird.f32 %v2038_v12  ;;  %848 = vmatpush.msrb.mxu3 %v819_v63 }
 0x6de   :  { %vm744_vm14 = vmor %vm742_vm13, %vm743_vm12 }
 0x6df   :  { %v738_v18 = vmul.f32 %v2038_v12, %v737_v15  ;;  %v725_v19 = vpop.xlane.xlu1 %724  ;;  %849 = vmatpush.msrb.mxu3 %v818_v14 }
 0x6e0   :  { %v727_v23 = vmul.f32 %v725_v19, %v2243_v45 }
 0x6e1   :  { %v739_v25 = vmul.f32 0.5, %v738_v18  ;;  %850 = vmatpush.msrb.mxu3 %v817_v44 }
 0x6e2   :  { %v731_v26 = vsub.f32 %v727_v23, %v729_v22 }
 0x6e3   :  { %v740_v29 = vsub.f32 1.5, %v739_v25 }
 0x6e4   :  { %v735_v30 = vadd.f32 1e-12, %v731_v26 }
 0x6e5   :  { %v741_v31 = vmul.f32 %v2038_v12, %v740_v29 }
 0x6e6   :  { %2039 = vrsqrt.f32 %v735_v30  ;;  %vm752_vm0 = vweird.f32 %v735_v30 }
 0x6e7   :  { %v745_v34 = vsel %vm744_vm14, %v2038_v12, %v741_v31 }
 0x6e8   :  { %v756_v35 = vmul.f32 %v745_v34, %v732_v32 }
 0x6ea   :  { %v759_v38 = vmul.f32 %v1984_v33, %v756_v35 }
 0x6ec   :  { %v2040_v39 = vpop.eup %2039  ;;  %v2416_v40 = vadd.f32 %v1985_v36, %v759_v38 }
 0x6ed   :  { %v747_v42 = vmul.f32 %v2040_v39, %v735_v30  ;;  %vm753_vm15 = vweird.f32 %v2040_v39 }
 0x6ee   :  { %1863 = vmatmul.msk.f32.vlgmr.msra.gmra.mxu0 %vm95_vm2, %v2416_v40  ;;  %vm754_vm1 = vmor %vm752_vm0, %vm753_vm15 }
 0x6ef   :  { %v748_v43 = vmul.f32 %v2040_v39, %v747_v42  ;;  %v917_v42 = vld [vmem:[#allocation2 + $0x188] sm:$0xff] }
 0x6f1   :  { %v749_v46 = vmul.f32 0.5, %v748_v43 }
 0x6f3   :  { %v750_v47 = vsub.f32 1.5, %v749_v46  ;;  %v916_v46 = vld [vmem:[#allocation2 + $0x180] sm:$0xff] }
 0x6f5   :  { %v751_v48 = vmul.f32 %v2040_v39, %v750_v47 }
 0x6f7   :  { %v755_v50 = vsel %vm754_vm1, %v2040_v39, %v751_v48  ;;  %v919_v39 = vld [vmem:[#allocation2 + $0x198] sm:$0xff] }
 0x6f8   :  { %v757_v51 = vmul.f32 %v755_v50, %v733_v49  ;;  %940 = vmatpush.msra.mxu1 %v919_v39 }
 0x6fa   :  { %v760_v52 = vmul.f32 %v1984_v33, %v757_v51 }
 0x6fc   :  { %v2421_v53 = vadd.f32 %v1985_v36, %v760_v52 }
 0x6fe   :  { %1864 = vmatmul.msk.f32.gmra.mxu0 %vm95_vm2, %v2421_v53 }
 0x76b   :  { %v793_v1 = vpop.f32.mrf.mxu0 }
 0x76c   :  { %v794_v2 = vadd.f32 %v1986_v0, %v793_v1  ;;  %v1988_v1 = vld [vmem:[%s2639_s2 + $0x19] ss:$0 sm:$0xff] }
 0x76e   :  { %v801_v3 = vmul.f32 0.044715, %v794_v2  ;;  %v799_v10 = vmul.f32 0.5, %v794_v2 }
 0x770   :  { %v803_v4 = vmul.f32 %v801_v3, %v794_v2 }
 0x772   :  { %v805_v5 = vmul.f32 %v803_v4, %v794_v2  ;;  %v1989_v4 = vld [vmem:[%s2639_s2 + $0x1a] ss:$0 sm:$0xff] }
 0x774   :  { %v807_v6 = vadd.f32 %v805_v5, %v794_v2 }
 0x776   :  { %v809_v21 = vmul.f32 0.7978846, %v807_v6 }
 0x778   :  { %2041 = vtanh.f32 %v809_v21 }
 0x77b   :  { %v796_v7 = vpop.f32.mrf.mxu0 }
 0x77c   :  { %v797_v8 = vadd.f32 %v1986_v0, %v796_v7 }
 0x77e   :  { %v2042_v27 = vpop.eup %2041  ;;  %v802_v9 = vmul.f32 0.044715, %v797_v8  ;;  %v800_v19 = vmul.f32 0.5, %v797_v8 }
 0x77f   :  { %v813_v11 = vadd.f32 1.0, %v2042_v27 }
 0x780   :  { %v804_v12 = vmul.f32 %v802_v9, %v797_v8 }
 0x781   :  { %v815_v13 = vmul.f32 %v813_v11, %v799_v10 }
 0x782   :  { %v806_v15 = vmul.f32 %v804_v12, %v797_v8 }
 0x783   :  { %851 = vmatmul.f32.vlgmr.msrb.gmra.mxu3 %v815_v13 }
 0x784   :  { %v808_v16 = vadd.f32 %v806_v15, %v797_v8 }
 0x786   :  { %v810_v17 = vmul.f32 0.7978846, %v808_v16 }
 0x788   :  { %2043 = vtanh.f32 %v810_v17  ;;  %v1990_v17 = vld [vmem:[%s2639_s2 + $0x1b] ss:$0 sm:$0xff] }
 0x78e   :  { %v2044_v18 = vpop.eup %2043 }
 0x78f   :  { %v814_v22 = vadd.f32 1.0, %v2044_v18 }
 0x791   :  { %v816_v23 = vmul.f32 %v814_v22, %v800_v19 }
 0x793   :  { %854 = vmatmul.f32.gmra.mxu3 %v816_v23 }
 0x806   :  { %v852_v25 = vpop.f32.mrf.mxu3 }
 0x807   :  { %v853_v26 = vadd.f32 %v1987_v24, %v852_v25 }
 0x809   :  { %v858_v28 = vadd.f32 %v853_v26, %v2416_v40  ;;  %v918_v40 = vld [vmem:[#allocation2 + $0x190] sm:$0xff] }
 0x80a   :  { %941 = vmatpush.msra.mxu1 %v918_v40 }
 0x80b   :  { %v862_v29 = vsel %vm95_vm2, %v858_v28, 0.0  ;;  %v870_v30 = vmul.f32 %v858_v28, %v858_v28 }
 0x80c   :  { %863 = vadd.xlane.f32.xlu1 %v862_v29  ;;  %942 = vmatpush.msra.mxu1 %v917_v42 }
 0x80d   :  { %v872_v31 = vsel %vm95_vm2, %v870_v30, 0.0 }
 0x80e   :  { %873 = vadd.xlane.f32.xlu2 %v872_v31  ;;  %943 = vmatpush.msra.mxu1 %v916_v46 }
 0x816   :  { %v855_v32 = vpop.f32.mrf.mxu3 }
 0x817   :  { %v856_v33 = vadd.f32 %v1987_v24, %v855_v32 }
 0x819   :  { %v859_v34 = vadd.f32 %v856_v33, %v2421_v53 }
 0x81b   :  { %v865_v35 = vsel %vm95_vm2, %v859_v34, 0.0  ;;  %v871_v36 = vmul.f32 %v859_v34, %v859_v34 }
 0x81c   :  { %866 = vadd.xlane.f32.xlu0 %v865_v35 }
 0x81d   :  { %v875_v38 = vsel %vm95_vm2, %v871_v36, 0.0 }
 0x81e   :  { %876 = vadd.xlane.f32.xlu1 %v875_v38 }
 0x87f   :  { %v864_v43 = vpop.xlane.xlu1 %863 }
 0x880   :  { %v868_v47 = vmul.f32 %v864_v43, %v2243_v45  ;;  %v1045_v43 = vld [vmem:[#allocation2 + $0x1a0] sm:$0xff] }
 0x881   :  { %v874_v48 = vpop.xlane.xlu2 %873  ;;  %1193 = vmatpush.msra.mxu3 %v1045_v43 }
 0x882   :  { %v880_v49 = vmul.f32 %v868_v47, %v868_v47  ;;  %v878_v50 = vmul.f32 %v874_v48, %v2243_v45  ;;  %v884_v0 = vsub.f32 %v858_v28, %v868_v47 }
 0x884   :  { %v882_v51 = vsub.f32 %v878_v50, %v880_v49 }
 0x886   :  { %v886_v52 = vadd.f32 1e-12, %v882_v51 }
 0x888   :  { %2045 = vrsqrt.f32 %v886_v52  ;;  %vm894_vm4 = vweird.f32 %v886_v52 }
 0x88e   :  { %v2046_v53 = vpop.eup %2045 }
 0x88f   :  { %v889_v54 = vmul.f32 %v2046_v53, %v886_v52  ;;  %v867_v55 = vpop.xlane.xlu0 %866  ;;  %vm895_vm3 = vweird.f32 %v2046_v53 }
 0x890   :  { %v869_v56 = vmul.f32 %v867_v55, %v2243_v45  ;;  %vm896_vm5 = vmor %vm894_vm4, %vm895_vm3 }
 0x891   :  { %v890_v57 = vmul.f32 %v2046_v53, %v889_v54  ;;  %v877_v58 = vpop.xlane.xlu1 %876 }
 0x892   :  { %v881_v60 = vmul.f32 %v869_v56, %v869_v56  ;;  %v879_v59 = vmul.f32 %v877_v58, %v2243_v45  ;;  %v885_v11 = vsub.f32 %v859_v34, %v869_v56 }
 0x893   :  { %v891_v61 = vmul.f32 0.5, %v890_v57 }
 0x894   :  { %v883_v62 = vsub.f32 %v879_v59, %v881_v60 }
 0x895   :  { %v892_v63 = vsub.f32 1.5, %v891_v61 }
 0x896   :  { %v887_v14 = vadd.f32 1e-12, %v883_v62 }
 0x897   :  { %v893_v44 = vmul.f32 %v2046_v53, %v892_v63 }
 0x898   :  { %2047 = vrsqrt.f32 %v887_v14  ;;  %vm904_vm7 = vweird.f32 %v887_v14 }
 0x899   :  { %v897_v2 = vsel %vm896_vm5, %v2046_v53, %v893_v44 }
 0x89a   :  { %v908_v3 = vmul.f32 %v897_v2, %v884_v0 }
 0x89c   :  { %v911_v5 = vmul.f32 %v1988_v1, %v908_v3 }
 0x89e   :  { %v2048_v6 = vpop.eup %2047  ;;  %v2447_v21 = vadd.f32 %v1989_v4, %v911_v5 }
 0x89f   :  { %v899_v7 = vmul.f32 %v2048_v6, %v887_v14  ;;  %vm905_vm6 = vweird.f32 %v2048_v6 }
 0x8a0   :  { %1865 = vmatmul.msk.f32.vlgmr.msra.gmra.mxu1 %vm95_vm2, %v2447_v21  ;;  %vm906_vm8 = vmor %vm904_vm7, %vm905_vm6 }
 0x8a1   :  { %v900_v8 = vmul.f32 %v2048_v6, %v899_v7  ;;  %v2103_v7 = vld [vmem:[%s2638_s1] sm:$0xff] }
 0x8a3   :  { %v901_v27 = vmul.f32 0.5, %v900_v8 }
 0x8a5   :  { %v902_v9 = vsub.f32 1.5, %v901_v27 }
 0x8a7   :  { %v903_v10 = vmul.f32 %v2048_v6, %v902_v9 }
 0x8a9   :  { %v907_v12 = vsel %vm906_vm8, %v2048_v6, %v903_v10  ;;  %v2104_v10 = vld [vmem:[%s2638_s1 + $0x8] sm:$0xff] }
 0x8aa   :  { %v909_v13 = vmul.f32 %v907_v12, %v885_v11 }
 0x8ac   :  { %v912_v15 = vmul.f32 %v1988_v1, %v909_v13 }
 0x8ae   :  { %v2451_v16 = vadd.f32 %v1989_v4, %v912_v15 }
 0x8b0   :  { %1866 = vmatmul.msk.f32.gmra.mxu1 %vm95_vm2, %v2451_v16 }
 0x91d   :  { %v945_v18 = vpop.f32.mrf.mxu1 }
 0x91e   :  { %v946_v19 = vadd.f32 %v1990_v17, %v945_v18 }
 0x920   :  { %953 = vrot.lane.b32.xlu0 %v946_v19, %s2165_s13 }
 0x92d   :  { %v948_v22 = vpop.f32.mrf.mxu1 }
 0x92e   :  { %v949_v23 = vadd.f32 %v1990_v17, %v948_v22 }
 0x930   :  { %1048 = vrot.lane.b32.xlu0 %v949_v23, %s2167_s15  ;;  %955 = vrot.lane.b32.xlu2 %v949_v23, %s2165_s13  ;;  %v2471_v34 = vpack.i.bf16 %v946_v19, %v949_v23 }
 0x938   :  { %1052 = vrot.lane.b32.xlu2 %v949_v23, %s2166_s14 }
 0x98a   :  { %v956_v24 = vpop.permute.xlu2 %955 }
 0x98b   :  { %1867 = vmatpush.xpose.msk.msrb.mxu2 %vm200_vm10, %v956_v24 }
 0x992   :  { %v954_v25 = vpop.permute.xlu0 %953  ;;  %v1053_v26 = vpop.permute.xlu2 %1052 }
 0x993   :  { %1868 = vmatpush.xpose.msk.msrb.mxu2 %vm200_vm10, %v954_v25  ;;  %1873 = vmatpush.xpose.msk.msrb.mxu1 %vm200_vm10, %v1053_v26 }
 0x996   :  { %1869 = vmatmul.msk.f32.vlgmr.msrb.gmra.mxu2 %vm200_vm10, %v946_v19 }
 0x99e   :  { %1870 = vmatmul.msk.f32.gmra.mxu2 %vm200_vm10, %v949_v23 }
 0x9a2   :  { %v1049_v53 = vpop.permute.xlu0 %1048 }
 0xa19   :  { %v982_v28 = vpop.f32.mrf.mxu2 }
 0xa1a   :  { %v983_v29 = vadd.f32 %v982_v28, %v2307_v37 }
 0xa1c   :  { %v988_v30 = vsel %vm232_vm11, %v983_v29, -inf }
 0xa1d   :  { %989 = vmax.xlane.f32.xlu1 %v988_v30 }
 0xa21   :  { %v985_v31 = vpop.f32.mrf.mxu2 }
 0xa22   :  { %v986_v32 = vadd.f32 %v985_v31, %v2314_v41 }
 0xa24   :  { %v991_v33 = vsel %vm232_vm11, %v986_v32, -inf }
 0xa25   :  { %992 = vmax.xlane.f32.xlu1 %v991_v33 }
 0xa3e   :  { %1954 = vrot.lane.b32.xlu1 %v2471_v34, %s2168_s16 }
 0xa46   :  { %1050 = vrot.lane.b32.xlu1 %v946_v19, %s2166_s14  ;;  %s2179_s14 = smov [#allocation5]  }
 0xa4e   :  { %1046 = vrot.lane.b32.xlu1 %v946_v19, %s2167_s15  ;;  %s1811_s15 = sshll.u32 %s2179_s14, 4  ;;  %s1812_s15 = int_to_ptr.vmem [resolvable:$true] %s1811_s15 }
 0xa56   :  { %1335 = vrot.lane.b32.xlu1 %v949_v23, %s2172_s24 }
 0xa5e   :  { %1207 = vrot.lane.b32.xlu1 %v949_v23, %s2169_s17 }
 0xa66   :  { %1329 = vrot.lane.b32.xlu1 %v946_v19, %s2170_s18 }
 0xa6e   :  { %1205 = vrot.lane.b32.xlu1 %v946_v19, %s2169_s17  ;;  %s1813_s17 = sshll.u32 %s2642_s5, 4  ;;  %s1814_s17 = int_to_ptr.hbm [resolvable:$true] %s1813_s17 }
 0xa76   :  { %1331 = vrot.lane.b32.xlu1 %v949_v23, %s2170_s18 }
 0xa90   :  { %v990_v37 = vpop.xlane.xlu1 %989 }
 0xa91   :  { %v994_v41 = vsub.f32 %v983_v29, %v990_v37 }
 0xa93   :  { %v996_v35 = vmul.f32 1.442695, %v994_v41 }
 0xa95   :  { %2049 = vpow2.f32 %v996_v35 }
 0xa98   :  { %v993_v36 = vpop.xlane.xlu1 %992 }
 0xa99   :  { %v995_v38 = vsub.f32 %v986_v32, %v993_v36 }
 0xa9b   :  { %v2050_v39 = vpop.eup %2049  ;;  %v998_v40 = vmul.f32 1.442695, %v995_v38 }
 0xa9c   :  { %v1000_v42 = vsel %vm232_vm11, %v2050_v39, 0.0 }
 0xa9d   :  { %2051 = vpow2.f32 %v998_v40  ;;  %1001 = vadd.xlane.f32.xlu0 %v1000_v42 }
 0xaa3   :  { %v2052_v46 = vpop.eup %2051 }
 0xaa4   :  { %v1003_v47 = vsel %vm232_vm11, %v2052_v46, 0.0 }
 0xaa5   :  { %1004 = vadd.xlane.f32.xlu2 %v1003_v47 }
 0xab0   :  { %v1955_v48 = vpop.permute.xlu1 %1954 }
 0xab1   :  { %v1956_v49 = vunpack.i.l.bf16 %v1955_v48  ;;  %1201 = vrot.lane.b32.xlu0 %v946_v19, %s2173_s25  ;;  %v1957_v50 = vunpack.i.h.bf16 %v1955_v48 }
 0xab3   :  { %1032 = vmatpush.msrb.mxu0 %v1956_v49 }
 0xab5   :  { %1033 = vmatpush.msrb.mxu0 %v1957_v50 }
 0xab6   :  { %1871 = vmatmul.msk.f32.vlgmr.msrb.gmra.mxu0 %vm232_vm11, %v2050_v39 }
 0xab8   :  { %v1051_v51 = vpop.permute.xlu1 %1050 }
 0xab9   :  { %1203 = vrot.lane.b32.xlu0 %v949_v23, %s2173_s25  ;;  %1874 = vmatpush.xpose.msk.msrb.mxu1 %vm200_vm10, %v1051_v51 }
 0xabd   :  { %1333 = vrot.lane.b32.xlu2 %v946_v19, %s2172_s24 }
 0xabe   :  { %1872 = vmatmul.msk.f32.gmra.mxu0 %vm232_vm11, %v2052_v46 }
 0xac0   :  { %v1047_v52 = vpop.permute.xlu1 %1046 }
 0xac1   :  { %1959 = vrot.lane.b32.xlu0 %v2471_v34, %s2171_s23  ;;  %1875 = vmatmul.msk.f32.vlgmr.msrb.gmra.mxu1 %vm200_vm10, %v1047_v52 }
 0xac8   :  { %v1336_v54 = vpop.permute.xlu1 %1335 }
 0xac9   :  { %1876 = vmatmul.msk.f32.gmra.mxu1 %vm200_vm10, %v1049_v53  ;;  %1891 = vmatpush.xpose.msk.msrb.mxu3 %vm200_vm10, %v1336_v54  ;;  %v1142_v54 = vld [vmem:[#allocation2 + $0x1a8] sm:$0xff] }
 0xaca   :  { %1164 = vmatpush.msra.mxu0 %v1142_v54 }
 0xad0   :  { %v1208_v55 = vpop.permute.xlu1 %1207 }
 0xad1   :  { %1883 = vmatpush.xpose.msk.msra.mxu1 %vm200_vm10, %v1208_v55 }
 0xad8   :  { %v1330_v56 = vpop.permute.xlu1 %1329 }
 0xae0   :  { %v1206_v57 = vpop.permute.xlu1 %1205 }
 0xae1   :  { %1884 = vmatpush.xpose.msk.msra.mxu1 %vm200_vm10, %v1206_v57 }
 0xae8   :  { %v1332_v13 = vpop.permute.xlu1 %1331 }
 0xb10   :  { %v1002_v60 = vpop.xlane.xlu0 %1001 }
 0xb11   :  { %2053 = vrcp.f32 %v1002_v60 }
 0xb17   :  { %v2054_v63 = vpop.eup %2053 }
 0xb18   :  { %v1005_v58 = vpop.xlane.xlu2 %1004 }
 0xb19   :  { %2055 = vrcp.f32 %v1005_v58 }
 0xb1f   :  { %v2056_v3 = vpop.eup %2055 }
 0xb20   :  { %v1334_v59 = vpop.permute.xlu2 %1333 }
 0xb21   :  { %1892 = vmatpush.xpose.msk.msrb.mxu3 %vm200_vm10, %v1334_v59 }
 0xb23   :  { %v1202_v61 = vpop.permute.xlu0 %1201 }
 0xb24   :  { %1885 = vmatmul.msk.f32.vlgmr.msra.gmra.mxu1 %vm200_vm10, %v1202_v61 }
 0xb2b   :  { %v1204_v62 = vpop.permute.xlu0 %1203 }
 0xb2c   :  { %1886 = vmatmul.msk.f32.gmra.mxu1 %vm200_vm10, %v1204_v62 }
 0xb33   :  { %v1960_v14 = vpop.permute.xlu0 %1959  ;;  %v1035_v44 = vpop.f32.mrf.mxu0 }
 0xb34   :  { %v1961_v0 = vunpack.i.l.bf16 %v1960_v14  ;;  %v1043_v1 = vmul.f32 %v2054_v63, %v1035_v44  ;;  %v1962_v2 = vunpack.i.h.bf16 %v1960_v14 }
 0xb36   :  { %1129 = vmatpush.msra.mxu2 %v1961_v0  ;;  %1881 = vmatmul.msk.f32.vlgmr.msra.gmra.mxu3 %vm200_vm10, %v1043_v1 }
 0xb38   :  { %1130 = vmatpush.msra.mxu2 %v1962_v2 }
 0xb3b   :  { %v1038_v4 = vpop.f32.mrf.mxu0 }
 0xb3c   :  { %v1044_v5 = vmul.f32 %v2056_v3, %v1038_v4 }
 0xb3e   :  { %v1079_v6 = vpop.f32.mrf.mxu1  ;;  %1882 = vmatmul.msk.f32.gmra.mxu3 %vm200_vm10, %v1044_v5 }
 0xb3f   :  { %v1080_v8 = vadd.f32 %v2103_v7, %v1079_v6 }
 0xb41   :  { %v1085_v27 = vsel %vm232_vm11, %v1080_v8, -inf }
 0xb42   :  { %1086 = vmax.xlane.f32.xlu2 %v1085_v27 }
 0xb46   :  { %v1082_v9 = vpop.f32.mrf.mxu1  ;;  %1893 = vmatmul.msk.f32.vlgmr.msrb.gmra.mxu3 %vm200_vm10, %v1330_v56 }
 0xb47   :  { %v1083_v11 = vadd.f32 %v2104_v10, %v1082_v9 }
 0xb49   :  { %v1088_v12 = vsel %vm232_vm11, %v1083_v11, -inf }
 0xb4a   :  { %1089 = vmax.xlane.f32.xlu1 %v1088_v12 }
 0xb4e   :  { %1894 = vmatmul.msk.f32.gmra.mxu3 %vm200_vm10, %v1332_v13  ;;  %v1425_v13 = vld [vmem:[#allocation2 + $0x1b8] sm:$0xff] }
 0xba1   :  { %v1234_v15 = vpop.f32.mrf.mxu1 }
 0xba2   :  { %v1235_v17 = vadd.f32 %v2103_v7, %v1234_v15  ;;  %v1297_v15 = vld [vmem:[#allocation2 + $0x1b0] sm:$0xff] }
 0xba3   :  { %1319 = vmatpush.msrb.mxu0 %v1297_v15 }
 0xba4   :  { %v1240_v18 = vsel %vm232_vm11, %v1235_v17, -inf }
 0xba5   :  { %1241 = vmax.xlane.f32.xlu0 %v1240_v18 }
 0xba9   :  { %v1237_v19 = vpop.f32.mrf.mxu1 }
 0xbaa   :  { %v1238_v22 = vadd.f32 %v2104_v10, %v1237_v19 }
 0xbac   :  { %v1243_v23 = vsel %vm232_vm11, %v1238_v22, -inf }
 0xbad   :  { %1244 = vmax.xlane.f32.xlu1 %v1243_v23 }
 0xbb5   :  { %v1087_v24 = vpop.xlane.xlu2 %1086 }
 0xbb6   :  { %v1091_v25 = vsub.f32 %v1080_v8, %v1087_v24 }
 0xbb8   :  { %v1093_v26 = vmul.f32 1.442695, %v1091_v25 }
 0xbb9   :  { %v2514_v28 = vpop.f32.mrf.mxu3  ;;  %1969 = vrot.lane.b32.xlu0 %v2471_v34, %s2175_s3 }
 0xbba   :  { %2057 = vpow2.f32 %v1093_v26 }
 0xbbd   :  { %v1090_v29 = vpop.xlane.xlu1 %1089 }
 0xbbe   :  { %v1092_v30 = vsub.f32 %v1083_v11, %v1090_v29 }
 0xbc0   :  { %v2058_v31 = vpop.eup %2057  ;;  %v1095_v32 = vmul.f32 1.442695, %v1092_v30 }
 0xbc1   :  { %1877 = vmatmul.msk.f32.vlgmr.msra.gmra.mxu2 %vm232_vm11, %v2058_v31  ;;  %v2519_v33 = vpop.f32.mrf.mxu3  ;;  %v1097_v42 = vsel %vm232_vm11, %v2058_v31, 0.0 }
 0xbc2   :  { %2059 = vpow2.f32 %v1095_v32 }
 0xbc8   :  { %v2060_v37 = vpop.eup %2059 }
 0xbc9   :  { %1878 = vmatmul.msk.f32.gmra.mxu2 %vm232_vm11, %v2060_v37  ;;  %v1362_v41 = vpop.f32.mrf.mxu3  ;;  %v1100_v43 = vsel %vm232_vm11, %v2060_v37, 0.0 }
 0xbca   :  { %v1363_v35 = vadd.f32 %v2103_v7, %v1362_v41 }
 0xbcc   :  { %v1368_v36 = vsel %vm232_vm11, %v1363_v35, -inf }
 0xbcd   :  { %1369 = vmax.xlane.f32.xlu2 %v1368_v36 }
 0xbd1   :  { %v1365_v38 = vpop.f32.mrf.mxu3 }
 0xbd2   :  { %v1366_v39 = vadd.f32 %v2104_v10, %v1365_v38 }
 0xbd4   :  { %v1371_v40 = vsel %vm232_vm11, %v1366_v39, -inf }
 0xbd5   :  { %1372 = vmax.xlane.f32.xlu1 %v1371_v40 }
 0xbdd   :  { %1098 = vadd.xlane.f32.xlu1 %v1097_v42 }
 0xbe5   :  { %1964 = vrot.lane.b32.xlu2 %v2471_v34, %s2174_s26  ;;  %1101 = vadd.xlane.f32.xlu1 %v1100_v43 }
 0xc18   :  { %v1242_v46 = vpop.xlane.xlu0 %1241 }
 0xc19   :  { %v1246_v47 = vsub.f32 %v1235_v17, %v1242_v46 }
 0xc1b   :  { %v1248_v48 = vmul.f32 1.442695, %v1246_v47  ;;  %v1991_v47 = vld [vmem:[%s2639_s2 + $0x1c] ss:$0 sm:$0xff] }
 0xc1d   :  { %2061 = vpow2.f32 %v1248_v48 }
 0xc20   :  { %v1245_v55 = vpop.xlane.xlu1 %1244 }
 0xc21   :  { %v1247_v58 = vsub.f32 %v1238_v22, %v1245_v55 }
 0xc23   :  { %v2062_v49 = vpop.eup %2061  ;;  %v1250_v14 = vmul.f32 1.442695, %v1247_v58 }
 0xc24   :  { %v1252_v50 = vsel %vm232_vm11, %v2062_v49, 0.0 }
 0xc25   :  { %1253 = vadd.xlane.f32.xlu0 %v1252_v50 }
 0xc2b   :  { %v1970_v51 = vpop.permute.xlu0 %1969 }
 0xc2c   :  { %v1971_v52 = vunpack.i.l.bf16 %v1970_v51  ;;  %v1972_v53 = vunpack.i.h.bf16 %v1970_v51 }
 0xc2e   :  { %1412 = vmatpush.msrb.mxu1 %v1971_v52 }
 0xc30   :  { %1413 = vmatpush.msrb.mxu1 %v1972_v53 }
 0xc40   :  { %v1370_v56 = vpop.xlane.xlu2 %1369 }
 0xc41   :  { %v1374_v57 = vsub.f32 %v1363_v35, %v1370_v56 }
 0xc43   :  { %v1376_v34 = vmul.f32 1.442695, %v1374_v57 }
 0xc44   :  { %v1132_v6 = vpop.f32.mrf.mxu2 }
 0xc45   :  { %2063 = vpow2.f32 %v1376_v34 }
 0xc48   :  { %v1373_v60 = vpop.xlane.xlu1 %1372  ;;  %v1965_v59 = vpop.permute.xlu2 %1964 }
 0xc49   :  { %v1375_v61 = vsub.f32 %v1366_v39, %v1373_v60  ;;  %v1966_v62 = vunpack.i.l.bf16 %v1965_v59  ;;  %v1967_v0 = vunpack.i.h.bf16 %v1965_v59 }
 0xc4b   :  { %v2064_v63 = vpop.eup %2063  ;;  %v1378_v44 = vmul.f32 1.442695, %v1375_v61  ;;  %1284 = vmatpush.msrb.mxu2 %v1966_v62  ;;  %v1522_v61 = vld [vmem:[#allocation2 + $0x1d8] sm:$0xff]  ;;  %v1521_v62 = vld [vmem:[#allocation2 + $0x1d0] sm:$0xff] }
 0xc4c   :  { %1895 = vmatmul.msk.f32.vlgmr.msrb.gmra.mxu1 %vm232_vm11, %v2064_v63  ;;  %v1380_v1 = vsel %vm232_vm11, %v2064_v63, 0.0  ;;  %v1135_v11 = vpop.f32.mrf.mxu2 }
 0xc4d   :  { %2065 = vpow2.f32 %v1378_v44  ;;  %1381 = vadd.xlane.f32.xlu2 %v1380_v1  ;;  %1285 = vmatpush.msrb.mxu2 %v1967_v0 }
 0xc4e   :  { %1887 = vmatmul.msk.f32.vlgmr.msrb.gmra.mxu2 %vm232_vm11, %v2062_v49  ;;  %2067 = vpow2.f32 %v1250_v14  ;;  %v1519_v14 = vld [vmem:[#allocation2 + $0x1c0] sm:$0xff] }
 0xc4f   :  { %1447 = vmatpush.msra.mxu2 %v1425_v13  ;;  %v1584_v13 = vld [vmem:[#allocation2 + $0x240] sm:$0xff] }
 0xc50   :  { %v1099_v2 = vpop.xlane.xlu1 %1098 }
 0xc51   :  { %2069 = vrcp.f32 %v1099_v2 }
 0xc53   :  { %v2066_v3 = vpop.eup %2065 }
 0xc54   :  { %1896 = vmatmul.msk.f32.gmra.mxu1 %vm232_vm11, %v2066_v3  ;;  %v1383_v4 = vsel %vm232_vm11, %v2066_v3, 0.0  ;;  %v2068_v5 = vpop.eup %2067 }
 0xc55   :  { %1384 = vadd.xlane.f32.xlu1 %v1383_v4  ;;  %v1255_v9 = vsel %vm232_vm11, %v2068_v5, 0.0 }
 0xc56   :  { %1888 = vmatmul.msk.f32.gmra.mxu2 %vm232_vm11, %v2068_v5 }
 0xc57   :  { %v2070_v7 = vpop.eup %2069 }
 0xc58   :  { %v1140_v8 = vmul.f32 %v2070_v7, %v1132_v6  ;;  %v1102_v27 = vpop.xlane.xlu1 %1101  ;;  %v1587_v7 = vld [vmem:[#allocation2 + $0x258] sm:$0xff] }
 0xc59   :  { %2071 = vrcp.f32 %v1102_v27  ;;  %1590 = vmatpush.msra.mxu3 %v1587_v7 }
 0xc5a   :  { %1879 = vmatmul.msk.f32.vlgmr.msra.gmra.mxu0 %vm200_vm10, %v1140_v8  ;;  %v1586_v8 = vld [vmem:[#allocation2 + $0x250] sm:$0xff] }
 0xc5b   :  { %1543 = vmatpush.msra.mxu0 %v1522_v61  ;;  %1591 = vmatpush.msra.mxu3 %v1586_v8 }
 0xc5d   :  { %1256 = vadd.xlane.f32.xlu1 %v1255_v9  ;;  %1544 = vmatpush.msra.mxu0 %v1521_v62 }
 0xc5f   :  { %v2072_v10 = vpop.eup %2071 }
 0xc60   :  { %v1141_v12 = vmul.f32 %v2072_v10, %v1135_v11  ;;  %v1585_v10 = vld [vmem:[#allocation2 + $0x248] sm:$0xff] }
 0xc61   :  { %1592 = vmatpush.msra.mxu3 %v1585_v10 }
 0xc62   :  { %1880 = vmatmul.msk.f32.gmra.mxu0 %vm200_vm10, %v1141_v12 }
 0xc63   :  { %1593 = vmatpush.msra.mxu3 %v1584_v13 }
 0xc98   :  { %v1254_v18 = vpop.xlane.xlu0 %1253 }
 0xcc0   :  { %v1382_v17 = vpop.xlane.xlu2 %1381 }
 0xcc1   :  { %2073 = vrcp.f32 %v1382_v17 }
 0xcc2   :  { %2075 = vrcp.f32 %v1254_v18 }
 0xcc7   :  { %v2074_v22 = vpop.eup %2073 }
 0xcc8   :  { %v1385_v19 = vpop.xlane.xlu1 %1384  ;;  %v2076_v25 = vpop.eup %2075 }
 0xcc9   :  { %v1415_v23 = vpop.f32.mrf.mxu1  ;;  %2077 = vrcp.f32 %v1385_v19 }
 0xcca   :  { %v1423_v24 = vmul.f32 %v2074_v22, %v1415_v23 }
 0xccc   :  { %1897 = vmatmul.msk.f32.vlgmr.msra.gmra.mxu2 %vm200_vm10, %v1423_v24 }
 0xccf   :  { %v2078_v29 = vpop.eup %2077 }
 0xcd0   :  { %v1257_v26 = vpop.xlane.xlu1 %1256 }
 0xcd1   :  { %v1287_v30 = vpop.f32.mrf.mxu2  ;;  %v1418_v31 = vpop.f32.mrf.mxu1  ;;  %2079 = vrcp.f32 %v1257_v26  ;;  %v1992_v26 = vld [vmem:[%s2639_s2 + $0x1d] ss:$0 sm:$0xff] }
 0xcd2   :  { %v1295_v32 = vmul.f32 %v2076_v25, %v1287_v30  ;;  %v1424_v37 = vmul.f32 %v2078_v29, %v1418_v31 }
 0xcd4   :  { %1889 = vmatmul.msk.f32.vlgmr.msrb.gmra.mxu0 %vm200_vm10, %v1295_v32  ;;  %1898 = vmatmul.msk.f32.gmra.mxu2 %vm200_vm10, %v1424_v37  ;;  %v1993_v32 = vld [vmem:[%s2639_s2 + $0x1e] ss:$0 sm:$0xff] }
 0xcd7   :  { %v2080_v41 = vpop.eup %2079  ;;  %v1166_v38 = vpop.f32.mrf.mxu0 }
 0xcd8   :  { %v1196_v40 = vadd.f32 %v2514_v28, %v1166_v38 }
 0xcd9   :  { %v1290_v35 = vpop.f32.mrf.mxu2 }
 0xcda   :  { %v1296_v36 = vmul.f32 %v2080_v41, %v1290_v35 }
 0xcdc   :  { %1890 = vmatmul.msk.f32.gmra.mxu0 %vm200_vm10, %v1296_v36 }
 0xcdf   :  { %v1169_v39 = vpop.f32.mrf.mxu0 }
 0xce0   :  { %v1199_v50 = vadd.f32 %v2519_v33, %v1169_v39 }
 0xd4f   :  { %v1449_v42 = vpop.f32.mrf.mxu2 }
 0xd51   :  { %v1321_v43 = vpop.f32.mrf.mxu0 }
 0xd52   :  { %v1327_v46 = vadd.f32 %v1321_v43, %v1196_v40 }
 0xd54   :  { %v1455_v48 = vadd.f32 %v1449_v42, %v1327_v46 }
 0xd56   :  { %v1459_v49 = vadd.f32 %v1991_v47, %v1455_v48  ;;  %v1583_v48 = vld [vmem:[#allocation2 + $0x238] sm:$0xff] }
 0xd57   :  { %v1452_v28 = vpop.f32.mrf.mxu2  ;;  %1594 = vmatpush.msra.mxu3 %v1583_v48 }
 0xd58   :  { %v2548_v51 = vadd.f32 %v1459_v49, %v2447_v21  ;;  %v1582_v49 = vld [vmem:[#allocation2 + $0x230] sm:$0xff] }
 0xd59   :  { %v1324_v52 = vpop.f32.mrf.mxu0  ;;  %1595 = vmatpush.msra.mxu3 %v1582_v49 }
 0xd5a   :  { %v1328_v53 = vadd.f32 %v1324_v52, %v1199_v50  ;;  %v1465_v54 = vsel %vm95_vm2, %v2548_v51, 0.0  ;;  %v1473_v57 = vmul.f32 %v2548_v51, %v2548_v51  ;;  %v1581_v50 = vld [vmem:[#allocation2 + $0x228] sm:$0xff]  ;;  %v1579_v52 = vld [vmem:[#allocation2 + $0x218] sm:$0xff] }
 0xd5b   :  { %1466 = vadd.xlane.f32.xlu1 %v1465_v54  ;;  %1596 = vmatpush.msra.mxu3 %v1581_v50  ;;  %v1577_v54 = vld [vmem:[#allocation2 + $0x208] sm:$0xff] }
 0xd5c   :  { %v1456_v55 = vadd.f32 %v1452_v28, %v1328_v53  ;;  %v1475_v33 = vsel %vm95_vm2, %v1473_v57, 0.0  ;;  %v1578_v53 = vld [vmem:[#allocation2 + $0x210] sm:$0xff]  ;;  %v1576_v28 = vld [vmem:[#allocation2 + $0x200] sm:$0xff]  ;;  %v1573_v57 = vld [vmem:[#allocation2 + $0x1e8] sm:$0xff] }
 0xd5e   :  { %v1460_v56 = vadd.f32 %v1991_v47, %v1456_v55  ;;  %v1575_v55 = vld [vmem:[#allocation2 + $0x1f8] sm:$0xff] }
 0xd60   :  { %v2555_v34 = vadd.f32 %v1460_v56, %v2451_v16  ;;  %v1520_v16 = vld [vmem:[#allocation2 + $0x1c8] sm:$0xff]  ;;  %v1574_v56 = vld [vmem:[#allocation2 + $0x1f0] sm:$0xff] }
 0xd61   :  { %1545 = vmatpush.msra.mxu0 %v1520_v16 }
 0xd62   :  { %v1474_v21 = vmul.f32 %v2555_v34, %v2555_v34  ;;  %v1468_v60 = vsel %vm95_vm2, %v2555_v34, 0.0 }
 0xd63   :  { %1476 = vadd.xlane.f32.xlu1 %v1475_v33  ;;  %1546 = vmatpush.msra.mxu0 %v1519_v14  ;;  %v1994_v33 = vld [vmem:[%s2639_s2 + $0x1f] ss:$0 sm:$0xff] }
 0xd64   :  { %v1478_v58 = vsel %vm95_vm2, %v1474_v21, 0.0 }
 0xd65   :  { %1479 = vadd.xlane.f32.xlu2 %v1478_v58 }
 0xd6b   :  { %1469 = vadd.xlane.f32.xlu1 %v1468_v60 }
 0xdce   :  { %v1467_v59 = vpop.xlane.xlu1 %1466 }
 0xdcf   :  { %v1471_v63 = vmul.f32 %v1467_v59, %v2243_v45 }
 0xdd1   :  { %v1483_v0 = vmul.f32 %v1471_v63, %v1471_v63  ;;  %v1487_v25 = vsub.f32 %v2548_v51, %v1471_v63  ;;  %v1580_v51 = vld [vmem:[#allocation2 + $0x220] sm:$0xff] }
 0xdd2   :  { %1597 = vmatpush.msra.mxu3 %v1580_v51 }
 0xdd4   :  { %1598 = vmatpush.msra.mxu3 %v1579_v52 }
 0xdd6   :  { %v1477_v44 = vpop.xlane.xlu1 %1476  ;;  %1599 = vmatpush.msra.mxu3 %v1578_v53 }
 0xdd7   :  { %v1481_v1 = vmul.f32 %v1477_v44, %v2243_v45 }
 0xdd8   :  { %v1480_v4 = vpop.xlane.xlu2 %1479  ;;  %1600 = vmatpush.msra.mxu3 %v1577_v54 }
 0xdd9   :  { %v1485_v2 = vsub.f32 %v1481_v1, %v1483_v0  ;;  %v1482_v27 = vmul.f32 %v1480_v4, %v2243_v45 }
 0xdda   :  { %1601 = vmatpush.msra.mxu3 %v1576_v28 }
 0xddb   :  { %v1489_v3 = vadd.f32 1e-12, %v1485_v2 }
 0xddc   :  { %1602 = vmatpush.msra.mxu3 %v1575_v55 }
 0xddd   :  { %2081 = vrsqrt.f32 %v1489_v3  ;;  %vm1497_vm10 = vweird.f32 %v1489_v3 }
 0xdde   :  { %v1470_v5 = vpop.xlane.xlu1 %1469  ;;  %1603 = vmatpush.msra.mxu3 %v1574_v56 }
 0xddf   :  { %v1472_v6 = vmul.f32 %v1470_v5, %v2243_v45 }
 0xde0   :  { %1604 = vmatpush.msra.mxu3 %v1573_v57 }
 0xde1   :  { %v1484_v9 = vmul.f32 %v1472_v6, %v1472_v6  ;;  %v1488_v40 = vsub.f32 %v2555_v34, %v1472_v6  ;;  %v1572_v34 = vld [vmem:[#allocation2 + $0x1e0] sm:$0xff] }
 0xde2   :  { %1605 = vmatpush.msra.mxu3 %v1572_v34 }
 0xde3   :  { %v2082_v11 = vpop.eup %2081  ;;  %v1486_v12 = vsub.f32 %v1482_v27, %v1484_v9 }
 0xde4   :  { %v1492_v15 = vmul.f32 %v2082_v11, %v1489_v3  ;;  %vm1498_vm9 = vweird.f32 %v2082_v11 }
 0xde5   :  { %v1490_v17 = vadd.f32 1e-12, %v1486_v12  ;;  %vm1499_vm11 = vmor %vm1497_vm10, %vm1498_vm9  ;;  %vm1764_vm9 = vcmask 7168   ;;  %vm1802_vm10 = vcmask 0  }
 0xde6   :  { %v1493_v18 = vmul.f32 %v2082_v11, %v1492_v15 }
 0xde7   :  { %2083 = vrsqrt.f32 %v1490_v17  ;;  %vm1507_vm13 = vweird.f32 %v1490_v17 }
 0xde8   :  { %v1494_v19 = vmul.f32 0.5, %v1493_v18 }
 0xdea   :  { %v1495_v22 = vsub.f32 1.5, %v1494_v19 }
 0xdec   :  { %v1496_v23 = vmul.f32 %v2082_v11, %v1495_v22 }
 0xded   :  { %v2084_v24 = vpop.eup %2083 }
 0xdee   :  { %v1500_v29 = vsel %vm1499_vm11, %v2082_v11, %v1496_v23  ;;  %v1502_v30 = vmul.f32 %v2084_v24, %v1490_v17  ;;  %vm1508_vm12 = vweird.f32 %v2084_v24  ;;  %v1995_v11 = vld [vmem:[%s2639_s2 + $0x20] ss:$0 sm:$0xff] }
 0xdef   :  { %v1511_v31 = vmul.f32 %v1500_v29, %v1487_v25  ;;  %vm1509_vm14 = vmor %vm1507_vm13, %vm1508_vm12 }
 0xdf0   :  { %v1503_v37 = vmul.f32 %v2084_v24, %v1502_v30  ;;  %v1674_v30 = vld [vmem:[#allocation2 + $0x98] sm:$0xff] }
 0xdf1   :  { %v1514_v41 = vmul.f32 %v1992_v26, %v1511_v31  ;;  %1695 = vmatpush.msra.mxu1 %v1674_v30  ;;  %v1673_v31 = vld [vmem:[#allocation2 + $0x90] sm:$0xff] }
 0xdf2   :  { %v1504_v35 = vmul.f32 0.5, %v1503_v37 }
 0xdf3   :  { %v2574_v36 = vadd.f32 %v1993_v32, %v1514_v41  ;;  %1696 = vmatpush.msra.mxu1 %v1673_v31  ;;  %v1671_v41 = vld [vmem:[#allocation2 + $0x80] sm:$0xff] }
 0xdf4   :  { %v1505_v38 = vsub.f32 1.5, %v1504_v35 }
 0xdf5   :  { %1899 = vmatmul.msk.f32.vlgmr.msra.gmra.mxu0 %vm95_vm2, %v2574_v36 }
 0xdf6   :  { %v1506_v39 = vmul.f32 %v2084_v24, %v1505_v38 }
 0xdf8   :  { %v1510_v42 = vsel %vm1509_vm14, %v2084_v24, %v1506_v39 }
 0xdf9   :  { %v1512_v43 = vmul.f32 %v1510_v42, %v1488_v40  ;;  %v2176_v40 = vmov 1   ;;  %v2605_v42 = vld [vmem:[%s2637_s0] sm:$0xff] }
 0xdfa   :  { %1973 = vset.pattern.permute.xlu0 %v2176_v40  ;;  %1974 = vset.pattern.permute.xlu1 %v2176_v40  ;;  %vm1746_vm7 = vcmp.ne.s32.totalorder %v2605_v42, 4294967196 }
 0xdfb   :  { %v1515_v46 = vmul.f32 %v1992_v26, %v1512_v43 }
 0xdfd   :  { %v2579_v47 = vadd.f32 %v1993_v32, %v1515_v46  ;;  %v1672_v32 = vld [vmem:[#allocation2 + $0x88] sm:$0xff] }
 0xdfe   :  { %1697 = vmatpush.msra.mxu1 %v1672_v32 }
 0xdff   :  { %1900 = vmatmul.msk.f32.gmra.mxu0 %vm95_vm2, %v2579_v47 }
 0xe00   :  { %1698 = vmatpush.msra.mxu1 %v1671_v41 }
 0xe72   :  { %v1548_v21 = vpop.f32.mrf.mxu0 }
 0xe73   :  { %v1549_v58 = vadd.f32 %v1994_v33, %v1548_v21 }
 0xe75   :  { %v1556_v60 = vmul.f32 0.044715, %v1549_v58  ;;  %v1554_v4 = vmul.f32 0.5, %v1549_v58 }
 0xe77   :  { %v1558_v59 = vmul.f32 %v1556_v60, %v1549_v58 }
 0xe79   :  { %v1560_v61 = vmul.f32 %v1558_v59, %v1549_v58 }
 0xe7b   :  { %v1562_v62 = vadd.f32 %v1560_v61, %v1549_v58  ;;  %v1996_v58 = vld [vmem:[%s2639_s2 + $0x21] ss:$0 sm:$0xff]  ;;  %v1997_v61 = vld [vmem:[%s2639_s2 + $0x22] ss:$0 sm:$0xff] }
 0xe7c   :  { %v1551_v16 = vpop.f32.mrf.mxu0 }
 0xe7d   :  { %v1552_v63 = vadd.f32 %v1994_v33, %v1551_v16  ;;  %v1564_v14 = vmul.f32 0.7978846, %v1562_v62 }
 0xe7f   :  { %2085 = vtanh.f32 %v1564_v14  ;;  %v1557_v44 = vmul.f32 0.044715, %v1552_v63  ;;  %v1555_v27 = vmul.f32 0.5, %v1552_v63 }
 0xe81   :  { %v1559_v0 = vmul.f32 %v1557_v44, %v1552_v63 }
 0xe83   :  { %v1561_v1 = vmul.f32 %v1559_v0, %v1552_v63 }
 0xe85   :  { %v2086_v2 = vpop.eup %2085  ;;  %v1563_v3 = vadd.f32 %v1561_v1, %v1552_v63 }
 0xe86   :  { %v1568_v5 = vadd.f32 1.0, %v2086_v2 }
 0xe87   :  { %v1565_v6 = vmul.f32 0.7978846, %v1563_v3 }
 0xe88   :  { %v1570_v7 = vmul.f32 %v1568_v5, %v1554_v4 }
 0xe89   :  { %2087 = vtanh.f32 %v1565_v6  ;;  %v1998_v6 = vld [vmem:[%s2639_s2 + $0x12] ss:$0 sm:$0xff] }
 0xe8a   :  { %1606 = vmatmul.f32.vlgmr.msra.gmra.mxu3 %v1570_v7 }
 0xe8f   :  { %v2088_v8 = vpop.eup %2087 }
 0xe90   :  { %v1569_v9 = vadd.f32 1.0, %v2088_v8 }
 0xe92   :  { %v1571_v10 = vmul.f32 %v1569_v9, %v1555_v27 }
 0xe94   :  { %1609 = vmatmul.f32.gmra.mxu3 %v1571_v10  ;;  %v2106_v10 = vld [vmem:[%s2637_s0 + $0x8] sm:$0xff]  ;;  %s2178_s0 = smov 127  }
 0xe95   :  { %vm1747_vm8 = vcmp.ne.s32.totalorder %v2106_v10, 4294967196 }
 0xf0d   :  { %v1607_v12 = vpop.f32.mrf.mxu3 }
 0xf0e   :  { %v1608_v13 = vadd.f32 %v1995_v11, %v1607_v12 }
 0xf10   :  { %v1613_v15 = vadd.f32 %v1608_v13, %v2574_v36 }
 0xf12   :  { %v1617_v17 = vsel %vm95_vm2, %v1613_v15, 0.0  ;;  %v1625_v18 = vmul.f32 %v1613_v15, %v1613_v15 }
 0xf13   :  { %1618 = vadd.xlane.f32.xlu0 %v1617_v17 }
 0xf14   :  { %v1627_v19 = vsel %vm95_vm2, %v1625_v18, 0.0 }
 0xf15   :  { %1628 = vadd.xlane.f32.xlu1 %v1627_v19 }
 0xf17   :  { %v1610_v22 = vpop.f32.mrf.mxu3 }
 0xf18   :  { %v1611_v23 = vadd.f32 %v1995_v11, %v1610_v22 }
 0xf1a   :  { %v2593_v24 = vadd.f32 %v1611_v23, %v2579_v47 }
 0xf1c   :  { %v1620_v25 = vsel %vm95_vm2, %v2593_v24, 0.0  ;;  %v1626_v26 = vmul.f32 %v2593_v24, %v2593_v24 }
 0xf1d   :  { %1621 = vadd.xlane.f32.xlu2 %v1620_v25  ;;  %v2177_v25 = vmov 0.0  }
 0xf1e   :  { %v1630_v29 = vsel %vm95_vm2, %v1626_v26, 0.0 }
 0xf1f   :  { %1631 = vadd.xlane.f32.xlu0 %v1630_v29 }
 0xf33   :  { %1729 = vperm.xlu0 %1973, %v2605_v42  }
 0xf86   :  { %v1619_v37 = vpop.xlane.xlu0 %1618 }
 0xf87   :  { %v1623_v35 = vmul.f32 %v1619_v37, %v2243_v45 }
 0xf88   :  { %v1629_v36 = vpop.xlane.xlu1 %1628 }
 0xf89   :  { %v1635_v38 = vmul.f32 %v1623_v35, %v1623_v35  ;;  %v1633_v39 = vmul.f32 %v1629_v36, %v2243_v45  ;;  %v1639_v21 = vsub.f32 %v1613_v15, %v1623_v35 }
 0xf8b   :  { %v1637_v43 = vsub.f32 %v1633_v39, %v1635_v38 }
 0xf8d   :  { %v1641_v46 = vadd.f32 1e-12, %v1637_v43  ;;  %v1905_v43 = vsel %vm1746_vm7, 1.0, %v2177_v25 }
 0xf8f   :  { %2089 = vrsqrt.f32 %v1641_v46  ;;  %vm1649_vm0 = vweird.f32 %v1641_v46 }
 0xf90   :  { %v1622_v47 = vpop.xlane.xlu2 %1621 }
 0xf91   :  { %v1624_v48 = vmul.f32 %v1622_v47, %v2243_v45  ;;  %v1906_v47 = vsel %vm1747_vm8, 1.0, %v2177_v25 }
 0xf92   :  { %v1632_v49 = vpop.xlane.xlu0 %1631 }
 0xf93   :  { %v1636_v50 = vmul.f32 %v1624_v48, %v1624_v48  ;;  %v1634_v51 = vmul.f32 %v1632_v49, %v2243_v45  ;;  %v1640_v1 = vsub.f32 %v2593_v24, %v1624_v48 }
 0xf95   :  { %v2090_v52 = vpop.eup %2089  ;;  %v1638_v53 = vsub.f32 %v1634_v51, %v1636_v50 }
 0xf96   :  { %v1644_v54 = vmul.f32 %v2090_v52, %v1641_v46  ;;  %vm1650_vm15 = vweird.f32 %v2090_v52 }
 0xf97   :  { %v1642_v28 = vadd.f32 1e-12, %v1638_v53  ;;  %vm1651_vm1 = vmor %vm1649_vm0, %vm1650_vm15 }
 0xf98   :  { %v1645_v55 = vmul.f32 %v2090_v52, %v1644_v54 }
 0xf99   :  { %2091 = vrsqrt.f32 %v1642_v28  ;;  %vm1659_vm4 = vweird.f32 %v1642_v28 }
 0xf9a   :  { %v1646_v56 = vmul.f32 0.5, %v1645_v55 }
 0xf9c   :  { %v1647_v57 = vsub.f32 1.5, %v1646_v56 }
 0xf9e   :  { %v1648_v34 = vmul.f32 %v2090_v52, %v1647_v57 }
 0xf9f   :  { %v2092_v33 = vpop.eup %2091 }
 0xfa0   :  { %v1652_v60 = vsel %vm1651_vm1, %v2090_v52, %v1648_v34  ;;  %v1654_v45 = vmul.f32 %v2092_v33, %v1642_v28  ;;  %vm1660_vm3 = vweird.f32 %v2092_v33  ;;  %v1975_v52 = vpack.i.bf16 %v1906_v47, %v1905_v43 }
 0xfa1   :  { %v1663_v59 = vmul.f32 %v1652_v60, %v1639_v21  ;;  %vm1661_vm5 = vmor %vm1659_vm4, %vm1660_vm3 }
 0xfa2   :  { %v1655_v62 = vmul.f32 %v2092_v33, %v1654_v45 }
 0xfa3   :  { %v1666_v16 = vmul.f32 %v1996_v58, %v1663_v59 }
 0xfa4   :  { %v1656_v63 = vmul.f32 0.5, %v1655_v62 }
 0xfa5   :  { %v1669_v14 = vadd.f32 %v1997_v61, %v1666_v16  ;;  %v1730_v22 = vpop.permute.xlu0 %1729 }
 0xfa6   :  { %v1657_v44 = vsub.f32 1.5, %v1656_v63 }
 0xfa7   :  { %1901 = vmatmul.msk.f32.vlgmr.msra.gmra.mxu1 %vm95_vm2, %v1669_v14 }
 0xfa8   :  { %v1658_v0 = vmul.f32 %v2092_v33, %v1657_v44 }
 0xfaa   :  { %v1662_v2 = vsel %vm1661_vm5, %v2092_v33, %v1658_v0 }
 0xfab   :  { %v1664_v3 = vmul.f32 %v1662_v2, %v1640_v1 }
 0xfad   :  { %v1667_v4 = vmul.f32 %v1996_v58, %v1664_v3 }
 0xfaf   :  { %v1670_v5 = vadd.f32 %v1997_v61, %v1667_v4 }
 0xfb1   :  { %1902 = vmatmul.msk.f32.gmra.mxu1 %vm95_vm2, %v1670_v5  ;;  %vm1734_vm2 = vcmp.eq.s32.totalorder %v2219_v20, %v1730_v22 }
 0xfb2   :  { %v1903_v26 = vsel %vm1734_vm2, 1.0, %v2177_v25 }
0x1024   :  { %v1700_v7 = vpop.f32.mrf.mxu1 }
0x1025   :  { %v1701_v8 = vadd.f32 %v1998_v6, %v1700_v7 }
0x1027   :  { %1706 = vst [vmem:[%s2641_s4] sm:$0xff] %v1701_v8  ;;  %1708 = vmax.xlane.f32.xlu1 %v1701_v8  ;;  %v1740_v31 = vmul.f32 %v1903_v26, %v1701_v8 }
0x102e   :  { %v1703_v27 = vpop.f32.mrf.mxu1 }
0x102f   :  { %v1704_v9 = vadd.f32 %v1998_v6, %v1703_v27 }
0x1031   :  { %1707 = vst [vmem:[%s2641_s4 + $0x8] sm:$0xff] %v1704_v9  ;;  %1710 = vmax.xlane.f32.xlu2 %v1704_v9 }
0x1040   :  { %1732 = vperm.xlu1 %1974, %v2106_v10  }
0x109a   :  { %v1709_v11 = vpop.xlane.xlu1 %1708 }
0x109b   :  { %v1712_v12 = vsub.f32 %v1701_v8, %v1709_v11 }
0x109d   :  { %v1714_v13 = vmul.f32 1.442695, %v1712_v12 }
0x109f   :  { %2093 = vpow2.f32 %v1714_v13 }
0x10a4   :  { %v1711_v15 = vpop.xlane.xlu2 %1710 }
0x10a5   :  { %v2094_v17 = vpop.eup %2093  ;;  %v1713_v18 = vsub.f32 %v1704_v9, %v1711_v15 }
0x10a6   :  { %1718 = vadd.xlane.f32.xlu2 %v2094_v17 }
0x10a7   :  { %v1716_v19 = vmul.f32 1.442695, %v1713_v18 }
0x10a9   :  { %2095 = vpow2.f32 %v1716_v19 }
0x10af   :  { %v2096_v23 = vpop.eup %2095 }
0x10b0   :  { %1720 = vadd.xlane.f32.xlu2 %v2096_v23 }
0x10b2   :  { %v1733_v24 = vpop.permute.xlu1 %1732 }
0x10b3   :  { %vm1735_vm6 = vcmp.eq.s32.totalorder %v2219_v20, %v1733_v24 }
0x10b4   :  { %v1904_v29 = vsel %vm1735_vm6, 1.0, %v2177_v25 }
0x10b5   :  { %v1741_v30 = vmul.f32 %v1904_v29, %v1704_v9 }
0x10b7   :  { %1744 = vadd.xlane.f32.xlu1 %v1741_v30 }
0x10b8   :  { %1742 = vadd.xlane.f32.xlu2 %v1740_v31 }
0x1119   :  { %v1719_v32 = vpop.xlane.xlu2 %1718 }
0x111a   :  { %2097 = vlog2.f32 %v1719_v32 }
0x1120   :  { %v2098_v37 = vpop.eup %2097 }
0x1121   :  { %v1723_v35 = vmul.f32 0.6931472, %v2098_v37 }
0x1123   :  { %v1721_v41 = vpop.xlane.xlu2 %1720  ;;  %v1726_v38 = vadd.f32 %v1723_v35, %v1709_v11 }
0x1124   :  { %2099 = vlog2.f32 %v1721_v41 }
0x112a   :  { %v2100_v36 = vpop.eup %2099  ;;  %v1745_v48 = vpop.xlane.xlu1 %1744 }
0x112b   :  { %v1725_v39 = vmul.f32 0.6931472, %v2100_v36  ;;  %v1743_v40 = vpop.xlane.xlu2 %1742 }
0x112c   :  { %v1752_v20 = vsub.f32 %v1726_v38, %v1743_v40 }
0x112d   :  { %v1727_v46 = vadd.f32 %v1725_v39, %v1711_v15 }
0x112e   :  { %v1754_v49 = vmul.f32 %v1905_v43, %v1752_v20 }
0x112f   :  { %v1753_v50 = vsub.f32 %v1727_v46, %v1745_v48 }
0x1130   :  { %1758 = vrot.lane.b32.xlu2 %v1754_v49, %s2178_s0 }
0x1131   :  { %v1755_v51 = vmul.f32 %v1906_v47, %v1753_v50 }
0x1133   :  { %1760 = vrot.lane.b32.xlu0 %v1755_v51, %s2178_s0 }
0x113b   :  { %1976 = vrot.lane.b32.xlu0 %v1975_v52, %s2178_s0 }
0x118a   :  { %v1759_v42 = vpop.permute.xlu2 %1758 }
0x118b   :  { %v1765_v54 = vsel %vm1764_vm9, %v1759_v42, 0.0 }
0x11a5   :  { %v1761_v53 = vpop.permute.xlu0 %1760 }
0x11a6   :  { %v1766_v28 = vsel %vm1764_vm9, %v1761_v53, 0.0 }
0x11a7   :  { %v1767_v55 = vadd.f32 %v1766_v28, %v1765_v54 }
0x11a9   :  { %1768 = vadd.xlane.f32.xlu2 %v1767_v55 }
0x11ad   :  { %v1977_v56 = vpop.permute.xlu0 %1976 }
0x11ae   :  { %v1979_v57 = vunpack.i.h.bf16 %v1977_v56  ;;  %v1978_v34 = vunpack.i.l.bf16 %v1977_v56 }
0x11b0   :  { %v1786_v33 = vsel %vm1764_vm9, %v1978_v34, 0.0  ;;  %v1787_v21 = vsel %vm1764_vm9, %v1979_v57, 0.0 }
0x11b1   :  { %v1788_v58 = vadd.f32 %v1787_v21, %v1786_v33 }
0x11b3   :  { %1789 = vadd.xlane.f32.xlu0 %v1788_v58 }
0x121c   :  { %v1769_v60 = vpop.xlane.xlu2 %1768 }
0x121d   :  { %v1770_v45 = vrot.slane %v1769_v60, 4 }
0x121f   :  { %v1771_v59 = vadd.f32 %v1770_v45, %v1769_v60 }
0x1221   :  { %v1772_v61 = vrot.slane %v1771_v59, 2 }
0x1223   :  { %v1773_v62 = vadd.f32 %v1772_v61, %v1771_v59 }
0x1225   :  { %v1774_v16 = vrot.slane %v1773_v62, 1 }
0x1226   :  { %v1790_v63 = vpop.xlane.xlu0 %1789 }
0x1227   :  { %v1791_v14 = vrot.slane %v1790_v63, 4  ;;  %v1775_v44 = vadd.f32 %v1774_v16, %v1773_v62 }
0x1229   :  { %v1792_v0 = vadd.f32 %v1791_v14, %v1790_v63  ;;  %1907 = vpush %v1775_v44 }
0x122b   :  { %v1793_v1 = vrot.slane %v1792_v0, 2 }
0x122d   :  { %v1794_v2 = vadd.f32 %v1793_v1, %v1792_v0 }
0x122f   :  { %v1795_v3 = vrot.slane %v1794_v2, 1 }
0x1231   :  { %v1796_v4 = vadd.f32 %v1795_v3, %v1794_v2 }
0x1233   :  { %1909 = vpush %v1796_v4 }
0x125a   :  { %s1908_s2 = spop %1907 }
0x125b   :  { %v1777_v8 = vstv %s1908_s2 }
0x1264   :  { %s1910_s4 = spop %1909 }
0x1265   :  { %v1798_v5 = vstv %s1910_s4 }
0x1266   :  { %v1799_v6 = vmax.f32 %v1798_v5, 1.0 }
0x1268   :  { %2101 = vrcp.f32 %v1799_v6 }
0x126e   :  { %v2102_v7 = vpop.eup %2101 }
0x126f   :  { %v1801_v27 = vmul.f32 %v2102_v7, %v1777_v8 }
0x1271   :  { %1803 = vst.msk [vmem:[#allocation5] sm:$0x1] %vm1802_vm10, %v1801_v27 }
0x1272   :  { %1816 = dma.vmem_to_hbm [thread:$0]  %s1812_s15, 16, %s1814_s17, [#allocation4]  }
0x1273   :  { %2157 = dma.done.wait [#allocation4], 16  }
0x1274   :  { %2158 = vsyncadd [#allocation4], 4294967280 }
0x1275   :  { %1823 = vsyncpa [#allocation3], 1 }
0x1276   :  { %1824 = vsyncpa [#allocation4], 1 }

</bundles_post_ra>
